<compile_context>
chip_gen: v7x
topology: tpu7x:2x2x1
jax: 0.10.0
libtpu: 0.0.40
codegen_flags: <defaults>
</compile_context>

<pallas_src>
import jax
import jax.numpy as jnp
from jax.experimental import pallas as pl
from jax.experimental.pallas import tpu as pltpu  # noqa: F401  (TPU backend)

# ---- problem sizes (small, consistent with the module's forward) -----------
B = 2        # batch
S = 8        # encoder sequence length
T = 6        # decoder steps (teacher forcing length)
H = 32       # hidden size
V = 20       # encoder vocab size
C = 16       # number of decoder label classes
OUT = C + 4  # [label logits | x, y, w, h]


# ---------------------------------------------------------------------------
# Fused encoder + decoder kernel (single invocation, everything in VMEM)
# ---------------------------------------------------------------------------
def _seq2seq_kernel(acts_ref, wgru_ref, whead_ref, bias_ref, out_ref):
    acts = acts_ref[...]         # (S*B + 2*T*B, H)  activations slab
    wgru = wgru_ref[...]         # (4H, 3H)          GRU weight slab
    whead = whead_ref[...]       # (4H, H)           attention / head slab
    biases = bias_ref[...]       # (8, 3H)           bias slab

    # -- unpack slabs with static (sublane / lane-0) slices --
    xemb = acts[0:S * B, :]                  # (S*B, H) step-major
    lemb = acts[S * B:S * B + T * B, :]      # (T*B, H) step-major
    coords = acts[S * B + T * B:, :]         # (T*B, H), cols >= 4 are zero

    enc_wih = wgru[0:H, :]
    enc_whh = wgru[H:2 * H, :]
    dec_wih = wgru[2 * H:3 * H, :]
    dec_whh = wgru[3 * H:4 * H, :]

    watt = whead[0:2 * H, :]                 # (2H, H)
    wout_p = whead[2 * H:3 * H, :]           # (H, H), cols >= OUT are zero
    dec_win_p = whead[3 * H:4 * H, :]        # (H, H), rows >= 4 are zero

    enc_bih = biases[0:1, :]                                  # (1, 3H)
    enc_bhh_b = jnp.broadcast_to(biases[1:2, :], (B, 3 * H))  # hoisted bcast
    dec_bih = biases[2:3, :]
    dec_bhh_b = jnp.broadcast_to(biases[3:4, :], (B, 3 * H))  # hoisted bcast
    dec_bin = biases[4:5, :H]                                 # (1, H)
    b_out = biases[5:6, :H]                                   # (1, H), padded

    # GRU recurrence with the input-side projection already done (gi_all);
    # per step only gh = h @ whh remains on the serial chain.
    def gru_steps(gi_all, whh, bhh_b, h0, n_steps):
        h = h0
        rows = []
        for i in range(n_steps):
            gi = gi_all[i * B:(i + 1) * B, :]                 # (B, 3H)
            gh = jnp.dot(h, whh, preferred_element_type=jnp.float32) + bhh_b
            r = jax.nn.sigmoid(gi[:, :H] + gh[:, :H])
            z = jax.nn.sigmoid(gi[:, H:2 * H] + gh[:, H:2 * H])
            n = jnp.tanh(gi[:, 2 * H:] + r * gh[:, 2 * H:])
            h = (1.0 - z) * n + z * h
            rows.append(h)
        return h, jnp.concatenate(rows, axis=0)               # (n*B, H)

    # ----- encoder: batched gi, then S serial hidden updates -----
    gi_enc = jnp.dot(xemb, enc_wih, preferred_element_type=jnp.float32) + enc_bih
    h0 = jnp.zeros((B, H), jnp.float32)
    h_enc, enc = gru_steps(gi_enc, enc_whh, enc_bhh_b, h0, S)  # enc: (S*B, H)

    # ----- decoder: batched inputs + gi, then T serial hidden updates -----
    x_dec = (lemb
             + jnp.dot(coords, dec_win_p, preferred_element_type=jnp.float32)
             + dec_bin)
    gi_dec = jnp.dot(x_dec, dec_wih, preferred_element_type=jnp.float32) + dec_bih
    _, hs = gru_steps(gi_dec, dec_whh, dec_bhh_b, h_enc, T)    # hs: (T*B, H)

    # ----- deferred attention, batched over all T steps -----
    # scores[t*B + b, s*B + b'] = <h_{t,b}, enc_{s,b'}>; keep only b == b'
    # via a same-batch mask, so the masked softmax equals the per-batch
    # softmax over S positions and attn @ enc picks only that batch's rows.
    scores = jax.lax.dot_general(hs, enc, (((1,), (1,)), ((), ())),
                                 preferred_element_type=jnp.float32)  # (T*B, S*B)
    row_b = jax.lax.broadcasted_iota(jnp.int32, (T * B, S * B), 0) % B
    col_b = jax.lax.broadcasted_iota(jnp.int32, (T * B, S * B), 1) % B
    scores = jnp.where(row_b == col_b, scores, -1e30)
    m = jnp.max(scores, axis=-1, keepdims=True)
    e = jnp.exp(scores - m)
    attn = e * pl.reciprocal(jnp.sum(e, axis=-1, keepdims=True), approx=True)
    ctx = jnp.dot(attn, enc, preferred_element_type=jnp.float32)      # (T*B, H)

    # fused combine: single 64-deep MXU pass instead of two 32-deep ones.
    combined = jnp.tanh(
        jnp.dot(jnp.concatenate([hs, ctx], axis=-1), watt,
                preferred_element_type=jnp.float32))                  # (T*B, H)

    logits = jnp.dot(combined, wout_p,
                     preferred_element_type=jnp.float32) + b_out      # (T*B, H)
    l_logits = logits[:, :C]
    lmax = jnp.max(l_logits, axis=-1, keepdims=True)
    lse = lmax + jnp.log(jnp.sum(jnp.exp(l_logits - lmax),
                                 axis=-1, keepdims=True))
    # single output slab, stored once
    out_ref[...] = jnp.concatenate(
        [l_logits - lse, jax.nn.sigmoid(logits[:, C:C + 4])], axis=-1)


# ---------------------------------------------------------------------------
# One-time weight packing into 4 VMEM-friendly slabs (do outside per-call path)
# ---------------------------------------------------------------------------
def pack_weights(p):
    wgru = jnp.concatenate([p['enc_wih'], p['enc_whh'],
                            p['dec_wih'], p['dec_whh']], axis=0)       # (4H, 3H)

    wout_p = jnp.zeros((H, H), jnp.float32).at[:, :OUT].set(p['w_out'])
    dec_win_p = jnp.zeros((H, H), jnp.float32).at[:4, :].set(p['dec_win'])
    whead = jnp.concatenate([p['w_att'], wout_p, dec_win_p], axis=0)   # (4H, H)

    def pad3h(b):
        return jnp.zeros((1, 3 * H), jnp.float32).at[:, :b.shape[1]].set(b)

    biases = jnp.concatenate([
        pad3h(p['enc_bih']), pad3h(p['enc_bhh']),
        pad3h(p['dec_bih']), pad3h(p['dec_bhh']),
        pad3h(p['dec_bin']), pad3h(p['b_out']),
        jnp.zeros((2, 3 * H), jnp.float32)], axis=0)                   # (8, 3H)

    return {'wgru': wgru, 'whead': whead, 'biases': biases,
            'enc_emb': p['enc_emb'], 'dec_emb': p['dec_emb']}


# ---------------------------------------------------------------------------
# Seq2seq.forward equivalent (teacher-forcing path)
# ---------------------------------------------------------------------------
def seq2seq_forward(packed, input_variable, input_lengths=None,
                    target_l_variables=None, target_x_variables=None,
                    target_y_variables=None, target_w_variables=None,
                    target_h_variables=None, is_training=1,
                    early_stop_len=None):
    # TODO(synk): pack_padded_sequence length masking (input_lengths) and the
    # autoregressive is_training=0 sampling path (argmax feedback) are not
    # implemented; teacher-forcing path only.

    # Embedding gathers stay in the wrapper; rows are packed STEP-MAJOR so
    # the kernel's per-step slice is a plain sublane slice gi[i*B:(i+1)*B].
    xemb = packed['enc_emb'][input_variable.T].reshape(S * B, H)       # (S*B, H)
    lemb = packed['dec_emb'][target_l_variables.T].reshape(T * B, H)   # (T*B, H)
    coords = jnp.stack([target_x_variables.T, target_y_variables.T,
                        target_w_variables.T, target_h_variables.T],
                       axis=-1).reshape(T * B, 4).astype(jnp.float32)
    coords_p = jnp.zeros((T * B, H), jnp.float32).at[:, :4].set(coords)
    acts = jnp.concatenate([xemb, lemb, coords_p], axis=0)             # (40, H)

    out = pl.pallas_call(
        _seq2seq_kernel,
        out_shape=jax.ShapeDtypeStruct((T * B, OUT), jnp.float32),
    )(acts, packed['wgru'], packed['whead'], packed['biases'])

    out = out.reshape(T, B, OUT).transpose(1, 0, 2)                    # (B, T, OUT)
    return {
        'l_log_probs': out[:, :, :C],
        'x': out[:, :, C],
        'y': out[:, :, C + 1],
        'w': out[:, :, C + 2],
        'h': out[:, :, C + 3],
    }


# ---------------------------------------------------------------------------
# Pure-JAX reference (same math) for correctness checking
# ---------------------------------------------------------------------------
def _gru_step_ref(x, h, wih, whh, bih, bhh):
    gi = x @ wih + bih
    gh = h @ whh + bhh
    r = jax.nn.sigmoid(gi[:, :H] + gh[:, :H])
    z = jax.nn.sigmoid(gi[:, H:2 * H] + gh[:, H:2 * H])
    n = jnp.tanh(gi[:, 2 * H:] + r * gh[:, 2 * H:])
    return (1.0 - z) * n + z * h


def ref_forward(p, input_variable, tl, tx, ty, tw, th):
    x_emb = p['enc_emb'][input_variable]                        # (B, S, H)
    h = jnp.zeros((B, H), jnp.float32)
    enc_list = []
    for s in range(S):
        h = _gru_step_ref(x_emb[:, s], h, p['enc_wih'], p['enc_whh'],
                          p['enc_bih'], p['enc_bhh'])
        enc_list.append(h)
    enc_out = jnp.stack(enc_list, axis=1)                       # (B, S, H)

    lemb = p['dec_emb'][tl]                                     # (B, T, H)
    coords = jnp.stack([tx, ty, tw, th], axis=-1).astype(jnp.float32)
    outs = []
    for t in range(T):
        x = lemb[:, t] + coords[:, t] @ p['dec_win'] + p['dec_bin']
        h = _gru_step_ref(x, h, p['dec_wih'], p['dec_whh'],
                          p['dec_bih'], p['dec_bhh'])
        scores = jnp.einsum('bh,bsh->bs', h, enc_out)
        attn = jax.nn.softmax(scores, axis=-1)
        ctx = jnp.einsum('bs,bsh->bh', attn, enc_out)
        combined = jnp.tanh(h @ p['w_att'][:H] + ctx @ p['w_att'][H:])
        logits = combined @ p['w_out'] + p['b_out']
        l_log = jax.nn.log_softmax(logits[:, :C], axis=-1)
        box = jax.nn.sigmoid(logits[:, C:])
        outs.append(jnp.concatenate([l_log, box], axis=-1))
    out = jnp.stack(outs, axis=1)                               # (B, T, OUT)
    return {
        'l_log_probs': out[:, :, :C],
        'x': out[:, :, C], 'y': out[:, :, C + 1],
        'w': out[:, :, C + 2], 'h': out[:, :, C + 3],
    }


# ---------------------------------------------------------------------------
# Deterministic parameter init
# ---------------------------------------------------------------------------
def init_params(key):
    ks = jax.random.split(key, 14)
    n = lambda k, shp, sc=0.1: (jax.random.normal(k, shp, jnp.float32) * sc)
    return {
        'enc_emb': n(ks[0], (V, H)),
        'enc_wih': n(ks[1], (H, 3 * H)),
        'enc_whh': n(ks[2], (H, 3 * H)),
        'enc_bih': n(ks[3], (1, 3 * H), 0.01),
        'enc_bhh': n(ks[4], (1, 3 * H), 0.01),
        'dec_emb': n(ks[5], (C, H)),
        'dec_win': n(ks[6], (4, H)),
        'dec_bin': n(ks[7], (1, H), 0.01),
        'dec_wih': n(ks[8], (H, 3 * H)),
        'dec_whh': n(ks[9], (H, 3 * H)),
        'dec_bih': n(ks[10], (1, 3 * H), 0.01),
        'dec_bhh': n(ks[11], (1, 3 * H), 0.01),
        'w_att': n(ks[12], (2 * H, H)),
        'w_out': n(ks[13], (H, OUT)),
        'b_out': jnp.zeros((1, OUT), jnp.float32),
    }


if __name__ == "__main__":
    key = jax.random.PRNGKey(0)
    kp, k1, k2, k3, k4, k5, k6 = jax.random.split(key, 7)
    params = init_params(kp)
    packed = pack_weights(params)     # one-time packing, outside per-call path

    input_variable = jax.random.randint(k1, (B, S), 0, V)
    input_lengths = jnp.full((B,), S, jnp.int32)
    target_l = jax.random.randint(k2, (B, T), 0, C)
    target_x = jax.random.uniform(k3, (B, T), jnp.float32)
    target_y = jax.random.uniform(k4, (B, T), jnp.float32)
    target_w = jax.random.uniform(k5, (B, T), jnp.float32)
    target_h = jax.random.uniform(k6, (B, T), jnp.float32)

    result = seq2seq_forward(packed, input_variable, input_lengths,
                             target_l, target_x, target_y, target_w, target_h,
                             is_training=1)
    result = jax.tree_util.tree_map(jax.block_until_ready, result)

    ref = ref_forward(params, input_variable, target_l,
                      target_x, target_y, target_w, target_h)
    for k in result:
        assert jnp.allclose(result[k], ref[k], atol=2e-3, rtol=2e-3), k

    print("KERNEL_OK")
</pallas_src>

<mosaic_0001>
module attributes {stable_mosaic.version = 11 : i64} {
  func.func @_seq2seq_kernel(%arg0: memref<40x32xf32, #tpu.memory_space<vmem>>, %arg1: memref<128x96xf32, #tpu.memory_space<vmem>>, %arg2: memref<128x32xf32, #tpu.memory_space<vmem>>, %arg3: memref<8x96xf32, #tpu.memory_space<vmem>>, %arg4: memref<12x20xf32, #tpu.memory_space<vmem>>) attributes {dimension_semantics = [], scalar_prefetch = 0 : i64, scratch_operands = 0 : i64, tpu.core_type = #tpu.core_type<tc>} {
    %c0 = arith.constant 0 : index
    %c0_0 = arith.constant 0 : index
    %0 = vector.load %arg0[%c0, %c0_0] : memref<40x32xf32, #tpu.memory_space<vmem>>, vector<40x32xf32>
    %c0_1 = arith.constant 0 : index
    %c0_2 = arith.constant 0 : index
    %1 = vector.load %arg1[%c0_1, %c0_2] : memref<128x96xf32, #tpu.memory_space<vmem>>, vector<128x96xf32>
    %c0_3 = arith.constant 0 : index
    %c0_4 = arith.constant 0 : index
    %2 = vector.load %arg2[%c0_3, %c0_4] : memref<128x32xf32, #tpu.memory_space<vmem>>, vector<128x32xf32>
    %c0_5 = arith.constant 0 : index
    %c0_6 = arith.constant 0 : index
    %3 = vector.load %arg3[%c0_5, %c0_6] : memref<8x96xf32, #tpu.memory_space<vmem>>, vector<8x96xf32>
    %4 = vector.extract_strided_slice %0 {offsets = [0, 0], sizes = [16, 32], strides = [1, 1]} : vector<40x32xf32> to vector<16x32xf32>
    %5 = vector.extract_strided_slice %0 {offsets = [16, 0], sizes = [12, 32], strides = [1, 1]} : vector<40x32xf32> to vector<12x32xf32>
    %6 = vector.extract_strided_slice %0 {offsets = [28, 0], sizes = [12, 32], strides = [1, 1]} : vector<40x32xf32> to vector<12x32xf32>
    %7 = vector.extract_strided_slice %1 {offsets = [0, 0], sizes = [32, 96], strides = [1, 1]} : vector<128x96xf32> to vector<32x96xf32>
    %8 = vector.extract_strided_slice %1 {offsets = [32, 0], sizes = [32, 96], strides = [1, 1]} : vector<128x96xf32> to vector<32x96xf32>
    %9 = vector.extract_strided_slice %1 {offsets = [64, 0], sizes = [32, 96], strides = [1, 1]} : vector<128x96xf32> to vector<32x96xf32>
    %10 = vector.extract_strided_slice %1 {offsets = [96, 0], sizes = [32, 96], strides = [1, 1]} : vector<128x96xf32> to vector<32x96xf32>
    %11 = vector.extract_strided_slice %2 {offsets = [0, 0], sizes = [64, 32], strides = [1, 1]} : vector<128x32xf32> to vector<64x32xf32>
    %12 = vector.extract_strided_slice %2 {offsets = [64, 0], sizes = [32, 32], strides = [1, 1]} : vector<128x32xf32> to vector<32x32xf32>
    %13 = vector.extract_strided_slice %2 {offsets = [96, 0], sizes = [32, 32], strides = [1, 1]} : vector<128x32xf32> to vector<32x32xf32>
    %14 = vector.extract_strided_slice %3 {offsets = [0, 0], sizes = [1, 96], strides = [1, 1]} : vector<8x96xf32> to vector<1x96xf32>
    %15 = vector.extract_strided_slice %3 {offsets = [1, 0], sizes = [1, 96], strides = [1, 1]} : vector<8x96xf32> to vector<1x96xf32>
    %16 = vector.shape_cast %15 : vector<1x96xf32> to vector<1x96xf32>
    %17 = vector.broadcast %16 : vector<1x96xf32> to vector<2x96xf32>
    %18 = vector.extract_strided_slice %3 {offsets = [2, 0], sizes = [1, 96], strides = [1, 1]} : vector<8x96xf32> to vector<1x96xf32>
    %19 = vector.extract_strided_slice %3 {offsets = [3, 0], sizes = [1, 96], strides = [1, 1]} : vector<8x96xf32> to vector<1x96xf32>
    %20 = vector.shape_cast %19 : vector<1x96xf32> to vector<1x96xf32>
    %21 = vector.broadcast %20 : vector<1x96xf32> to vector<2x96xf32>
    %22 = vector.extract_strided_slice %3 {offsets = [4, 0], sizes = [1, 32], strides = [1, 1]} : vector<8x96xf32> to vector<1x32xf32>
    %23 = vector.extract_strided_slice %3 {offsets = [5, 0], sizes = [1, 32], strides = [1, 1]} : vector<8x96xf32> to vector<1x32xf32>
    %cst = arith.constant dense<0.000000e+00> : vector<16x96xf32>
    %24 = tpu.matmul %4, %7, %cst {dimension_numbers = #tpu.dot_dimension_numbers<[1], [0], [0], [1], [0, 0, 1, 1], [], []>} : vector<16x32xf32>, vector<32x96xf32>, vector<16x96xf32> -> vector<16x96xf32>
    %25 = vector.broadcast %14 : vector<1x96xf32> to vector<16x96xf32>
    %26 = arith.addf %24, %25 : vector<16x96xf32>
    %cst_7 = arith.constant 0.000000e+00 : f32
    %27 = vector.broadcast %cst_7 : f32 to vector<2x32xf32>
    %28 = vector.extract_strided_slice %26 {offsets = [0, 0], sizes = [2, 96], strides = [1, 1]} : vector<16x96xf32> to vector<2x96xf32>
    %cst_8 = arith.constant dense<0.000000e+00> : vector<2x96xf32>
    %29 = tpu.matmul %27, %8, %cst_8 {dimension_numbers = #tpu.dot_dimension_numbers<[1], [0], [0], [1], [0, 0, 1, 1], [], []>} : vector<2x32xf32>, vector<32x96xf32>, vector<2x96xf32> -> vector<2x96xf32>
    %30 = arith.addf %29, %17 : vector<2x96xf32>
    %31 = vector.extract_strided_slice %28 {offsets = [0, 0], sizes = [2, 32], strides = [1, 1]} : vector<2x96xf32> to vector<2x32xf32>
    %32 = vector.extract_strided_slice %30 {offsets = [0, 0], sizes = [2, 32], strides = [1, 1]} : vector<2x96xf32> to vector<2x32xf32>
    %33 = arith.addf %31, %32 : vector<2x32xf32>
    %34 = arith.negf %33 : vector<2x32xf32>
    %35 = math.exp %34 : vector<2x32xf32>
    %cst_9 = arith.constant 1.000000e+00 : f32
    %36 = vector.broadcast %cst_9 : f32 to vector<2x32xf32>
    %37 = arith.addf %36, %35 : vector<2x32xf32>
    %38 = arith.divf %36, %37 : vector<2x32xf32>
    %39 = vector.extract_strided_slice %28 {offsets = [0, 32], sizes = [2, 32], strides = [1, 1]} : vector<2x96xf32> to vector<2x32xf32>
    %40 = vector.extract_strided_slice %30 {offsets = [0, 32], sizes = [2, 32], strides = [1, 1]} : vector<2x96xf32> to vector<2x32xf32>
    %41 = arith.addf %39, %40 : vector<2x32xf32>
    %42 = arith.negf %41 : vector<2x32xf32>
    %43 = math.exp %42 : vector<2x32xf32>
    %cst_10 = arith.constant 1.000000e+00 : f32
    %44 = vector.broadcast %cst_10 : f32 to vector<2x32xf32>
    %45 = arith.addf %44, %43 : vector<2x32xf32>
    %46 = arith.divf %44, %45 : vector<2x32xf32>
    %47 = vector.extract_strided_slice %28 {offsets = [0, 64], sizes = [2, 32], strides = [1, 1]} : vector<2x96xf32> to vector<2x32xf32>
    %48 = vector.extract_strided_slice %30 {offsets = [0, 64], sizes = [2, 32], strides = [1, 1]} : vector<2x96xf32> to vector<2x32xf32>
    %49 = arith.mulf %38, %48 : vector<2x32xf32>
    %50 = arith.addf %47, %49 : vector<2x32xf32>
    %51 = math.tanh %50 : vector<2x32xf32>
    %cst_11 = arith.constant 1.000000e+00 : f32
    %52 = vector.broadcast %cst_11 : f32 to vector<2x32xf32>
    %53 = arith.subf %52, %46 : vector<2x32xf32>
    %54 = arith.mulf %53, %51 : vector<2x32xf32>
    %55 = arith.mulf %46, %27 : vector<2x32xf32>
    %56 = arith.addf %54, %55 : vector<2x32xf32>
    %57 = vector.extract_strided_slice %26 {offsets = [2, 0], sizes = [2, 96], strides = [1, 1]} : vector<16x96xf32> to vector<2x96xf32>
    %cst_12 = arith.constant dense<0.000000e+00> : vector<2x96xf32>
    %58 = tpu.matmul %56, %8, %cst_12 {dimension_numbers = #tpu.dot_dimension_numbers<[1], [0], [0], [1], [0, 0, 1, 1], [], []>} : vector<2x32xf32>, vector<32x96xf32>, vector<2x96xf32> -> vector<2x96xf32>
    %59 = arith.addf %58, %17 : vector<2x96xf32>
    %60 = vector.extract_strided_slice %57 {offsets = [0, 0], sizes = [2, 32], strides = [1, 1]} : vector<2x96xf32> to vector<2x32xf32>
    %61 = vector.extract_strided_slice %59 {offsets = [0, 0], sizes = [2, 32], strides = [1, 1]} : vector<2x96xf32> to vector<2x32xf32>
    %62 = arith.addf %60, %61 : vector<2x32xf32>
    %63 = arith.negf %62 : vector<2x32xf32>
    %64 = math.exp %63 : vector<2x32xf32>
    %cst_13 = arith.constant 1.000000e+00 : f32
    %65 = vector.broadcast %cst_13 : f32 to vector<2x32xf32>
    %66 = arith.addf %65, %64 : vector<2x32xf32>
    %67 = arith.divf %65, %66 : vector<2x32xf32>
    %68 = vector.extract_strided_slice %57 {offsets = [0, 32], sizes = [2, 32], strides = [1, 1]} : vector<2x96xf32> to vector<2x32xf32>
    %69 = vector.extract_strided_slice %59 {offsets = [0, 32], sizes = [2, 32], strides = [1, 1]} : vector<2x96xf32> to vector<2x32xf32>
    %70 = arith.addf %68, %69 : vector<2x32xf32>
    %71 = arith.negf %70 : vector<2x32xf32>
    %72 = math.exp %71 : vector<2x32xf32>
    %cst_14 = arith.constant 1.000000e+00 : f32
    %73 = vector.broadcast %cst_14 : f32 to vector<2x32xf32>
    %74 = arith.addf %73, %72 : vector<2x32xf32>
    %75 = arith.divf %73, %74 : vector<2x32xf32>
    %76 = vector.extract_strided_slice %57 {offsets = [0, 64], sizes = [2, 32], strides = [1, 1]} : vector<2x96xf32> to vector<2x32xf32>
    %77 = vector.extract_strided_slice %59 {offsets = [0, 64], sizes = [2, 32], strides = [1, 1]} : vector<2x96xf32> to vector<2x32xf32>
    %78 = arith.mulf %67, %77 : vector<2x32xf32>
    %79 = arith.addf %76, %78 : vector<2x32xf32>
    %80 = math.tanh %79 : vector<2x32xf32>
    %cst_15 = arith.constant 1.000000e+00 : f32
    %81 = vector.broadcast %cst_15 : f32 to vector<2x32xf32>
    %82 = arith.subf %81, %75 : vector<2x32xf32>
    %83 = arith.mulf %82, %80 : vector<2x32xf32>
    %84 = arith.mulf %75, %56 : vector<2x32xf32>
    %85 = arith.addf %83, %84 : vector<2x32xf32>
    %86 = vector.extract_strided_slice %26 {offsets = [4, 0], sizes = [2, 96], strides = [1, 1]} : vector<16x96xf32> to vector<2x96xf32>
    %cst_16 = arith.constant dense<0.000000e+00> : vector<2x96xf32>
    %87 = tpu.matmul %85, %8, %cst_16 {dimension_numbers = #tpu.dot_dimension_numbers<[1], [0], [0], [1], [0, 0, 1, 1], [], []>} : vector<2x32xf32>, vector<32x96xf32>, vector<2x96xf32> -> vector<2x96xf32>
    %88 = arith.addf %87, %17 : vector<2x96xf32>
    %89 = vector.extract_strided_slice %86 {offsets = [0, 0], sizes = [2, 32], strides = [1, 1]} : vector<2x96xf32> to vector<2x32xf32>
    %90 = vector.extract_strided_slice %88 {offsets = [0, 0], sizes = [2, 32], strides = [1, 1]} : vector<2x96xf32> to vector<2x32xf32>
    %91 = arith.addf %89, %90 : vector<2x32xf32>
    %92 = arith.negf %91 : vector<2x32xf32>
    %93 = math.exp %92 : vector<2x32xf32>
    %cst_17 = arith.constant 1.000000e+00 : f32
    %94 = vector.broadcast %cst_17 : f32 to vector<2x32xf32>
    %95 = arith.addf %94, %93 : vector<2x32xf32>
    %96 = arith.divf %94, %95 : vector<2x32xf32>
    %97 = vector.extract_strided_slice %86 {offsets = [0, 32], sizes = [2, 32], strides = [1, 1]} : vector<2x96xf32> to vector<2x32xf32>
    %98 = vector.extract_strided_slice %88 {offsets = [0, 32], sizes = [2, 32], strides = [1, 1]} : vector<2x96xf32> to vector<2x32xf32>
    %99 = arith.addf %97, %98 : vector<2x32xf32>
    %100 = arith.negf %99 : vector<2x32xf32>
    %101 = math.exp %100 : vector<2x32xf32>
    %cst_18 = arith.constant 1.000000e+00 : f32
    %102 = vector.broadcast %cst_18 : f32 to vector<2x32xf32>
    %103 = arith.addf %102, %101 : vector<2x32xf32>
    %104 = arith.divf %102, %103 : vector<2x32xf32>
    %105 = vector.extract_strided_slice %86 {offsets = [0, 64], sizes = [2, 32], strides = [1, 1]} : vector<2x96xf32> to vector<2x32xf32>
    %106 = vector.extract_strided_slice %88 {offsets = [0, 64], sizes = [2, 32], strides = [1, 1]} : vector<2x96xf32> to vector<2x32xf32>
    %107 = arith.mulf %96, %106 : vector<2x32xf32>
    %108 = arith.addf %105, %107 : vector<2x32xf32>
    %109 = math.tanh %108 : vector<2x32xf32>
    %cst_19 = arith.constant 1.000000e+00 : f32
    %110 = vector.broadcast %cst_19 : f32 to vector<2x32xf32>
    %111 = arith.subf %110, %104 : vector<2x32xf32>
    %112 = arith.mulf %111, %109 : vector<2x32xf32>
    %113 = arith.mulf %104, %85 : vector<2x32xf32>
    %114 = arith.addf %112, %113 : vector<2x32xf32>
    %115 = vector.extract_strided_slice %26 {offsets = [6, 0], sizes = [2, 96], strides = [1, 1]} : vector<16x96xf32> to vector<2x96xf32>
    %cst_20 = arith.constant dense<0.000000e+00> : vector<2x96xf32>
    %116 = tpu.matmul %114, %8, %cst_20 {dimension_numbers = #tpu.dot_dimension_numbers<[1], [0], [0], [1], [0, 0, 1, 1], [], []>} : vector<2x32xf32>, vector<32x96xf32>, vector<2x96xf32> -> vector<2x96xf32>
    %117 = arith.addf %116, %17 : vector<2x96xf32>
    %118 = vector.extract_strided_slice %115 {offsets = [0, 0], sizes = [2, 32], strides = [1, 1]} : vector<2x96xf32> to vector<2x32xf32>
    %119 = vector.extract_strided_slice %117 {offsets = [0, 0], sizes = [2, 32], strides = [1, 1]} : vector<2x96xf32> to vector<2x32xf32>
    %120 = arith.addf %118, %119 : vector<2x32xf32>
    %121 = arith.negf %120 : vector<2x32xf32>
    %122 = math.exp %121 : vector<2x32xf32>
    %cst_21 = arith.constant 1.000000e+00 : f32
    %123 = vector.broadcast %cst_21 : f32 to vector<2x32xf32>
    %124 = arith.addf %123, %122 : vector<2x32xf32>
    %125 = arith.divf %123, %124 : vector<2x32xf32>
    %126 = vector.extract_strided_slice %115 {offsets = [0, 32], sizes = [2, 32], strides = [1, 1]} : vector<2x96xf32> to vector<2x32xf32>
    %127 = vector.extract_strided_slice %117 {offsets = [0, 32], sizes = [2, 32], strides = [1, 1]} : vector<2x96xf32> to vector<2x32xf32>
    %128 = arith.addf %126, %127 : vector<2x32xf32>
    %129 = arith.negf %128 : vector<2x32xf32>
    %130 = math.exp %129 : vector<2x32xf32>
    %cst_22 = arith.constant 1.000000e+00 : f32
    %131 = vector.broadcast %cst_22 : f32 to vector<2x32xf32>
    %132 = arith.addf %131, %130 : vector<2x32xf32>
    %133 = arith.divf %131, %132 : vector<2x32xf32>
    %134 = vector.extract_strided_slice %115 {offsets = [0, 64], sizes = [2, 32], strides = [1, 1]} : vector<2x96xf32> to vector<2x32xf32>
    %135 = vector.extract_strided_slice %117 {offsets = [0, 64], sizes = [2, 32], strides = [1, 1]} : vector<2x96xf32> to vector<2x32xf32>
    %136 = arith.mulf %125, %135 : vector<2x32xf32>
    %137 = arith.addf %134, %136 : vector<2x32xf32>
    %138 = math.tanh %137 : vector<2x32xf32>
    %cst_23 = arith.constant 1.000000e+00 : f32
    %139 = vector.broadcast %cst_23 : f32 to vector<2x32xf32>
    %140 = arith.subf %139, %133 : vector<2x32xf32>
    %141 = arith.mulf %140, %138 : vector<2x32xf32>
    %142 = arith.mulf %133, %114 : vector<2x32xf32>
    %143 = arith.addf %141, %142 : vector<2x32xf32>
    %144 = vector.extract_strided_slice %26 {offsets = [8, 0], sizes = [2, 96], strides = [1, 1]} : vector<16x96xf32> to vector<2x96xf32>
    %cst_24 = arith.constant dense<0.000000e+00> : vector<2x96xf32>
    %145 = tpu.matmul %143, %8, %cst_24 {dimension_numbers = #tpu.dot_dimension_numbers<[1], [0], [0], [1], [0, 0, 1, 1], [], []>} : vector<2x32xf32>, vector<32x96xf32>, vector<2x96xf32> -> vector<2x96xf32>
    %146 = arith.addf %145, %17 : vector<2x96xf32>
    %147 = vector.extract_strided_slice %144 {offsets = [0, 0], sizes = [2, 32], strides = [1, 1]} : vector<2x96xf32> to vector<2x32xf32>
    %148 = vector.extract_strided_slice %146 {offsets = [0, 0], sizes = [2, 32], strides = [1, 1]} : vector<2x96xf32> to vector<2x32xf32>
    %149 = arith.addf %147, %148 : vector<2x32xf32>
    %150 = arith.negf %149 : vector<2x32xf32>
    %151 = math.exp %150 : vector<2x32xf32>
    %cst_25 = arith.constant 1.000000e+00 : f32
    %152 = vector.broadcast %cst_25 : f32 to vector<2x32xf32>
    %153 = arith.addf %152, %151 : vector<2x32xf32>
    %154 = arith.divf %152, %153 : vector<2x32xf32>
    %155 = vector.extract_strided_slice %144 {offsets = [0, 32], sizes = [2, 32], strides = [1, 1]} : vector<2x96xf32> to vector<2x32xf32>
    %156 = vector.extract_strided_slice %146 {offsets = [0, 32], sizes = [2, 32], strides = [1, 1]} : vector<2x96xf32> to vector<2x32xf32>
    %157 = arith.addf %155, %156 : vector<2x32xf32>
    %158 = arith.negf %157 : vector<2x32xf32>
    %159 = math.exp %158 : vector<2x32xf32>
    %cst_26 = arith.constant 1.000000e+00 : f32
    %160 = vector.broadcast %cst_26 : f32 to vector<2x32xf32>
    %161 = arith.addf %160, %159 : vector<2x32xf32>
    %162 = arith.divf %160, %161 : vector<2x32xf32>
    %163 = vector.extract_strided_slice %144 {offsets = [0, 64], sizes = [2, 32], strides = [1, 1]} : vector<2x96xf32> to vector<2x32xf32>
    %164 = vector.extract_strided_slice %146 {offsets = [0, 64], sizes = [2, 32], strides = [1, 1]} : vector<2x96xf32> to vector<2x32xf32>
    %165 = arith.mulf %154, %164 : vector<2x32xf32>
    %166 = arith.addf %163, %165 : vector<2x32xf32>
    %167 = math.tanh %166 : vector<2x32xf32>
    %cst_27 = arith.constant 1.000000e+00 : f32
    %168 = vector.broadcast %cst_27 : f32 to vector<2x32xf32>
    %169 = arith.subf %168, %162 : vector<2x32xf32>
    %170 = arith.mulf %169, %167 : vector<2x32xf32>
    %171 = arith.mulf %162, %143 : vector<2x32xf32>
    %172 = arith.addf %170, %171 : vector<2x32xf32>
    %173 = vector.extract_strided_slice %26 {offsets = [10, 0], sizes = [2, 96], strides = [1, 1]} : vector<16x96xf32> to vector<2x96xf32>
    %cst_28 = arith.constant dense<0.000000e+00> : vector<2x96xf32>
    %174 = tpu.matmul %172, %8, %cst_28 {dimension_numbers = #tpu.dot_dimension_numbers<[1], [0], [0], [1], [0, 0, 1, 1], [], []>} : vector<2x32xf32>, vector<32x96xf32>, vector<2x96xf32> -> vector<2x96xf32>
    %175 = arith.addf %174, %17 : vector<2x96xf32>
    %176 = vector.extract_strided_slice %173 {offsets = [0, 0], sizes = [2, 32], strides = [1, 1]} : vector<2x96xf32> to vector<2x32xf32>
    %177 = vector.extract_strided_slice %175 {offsets = [0, 0], sizes = [2, 32], strides = [1, 1]} : vector<2x96xf32> to vector<2x32xf32>
    %178 = arith.addf %176, %177 : vector<2x32xf32>
    %179 = arith.negf %178 : vector<2x32xf32>
    %180 = math.exp %179 : vector<2x32xf32>
    %cst_29 = arith.constant 1.000000e+00 : f32
    %181 = vector.broadcast %cst_29 : f32 to vector<2x32xf32>
    %182 = arith.addf %181, %180 : vector<2x32xf32>
    %183 = arith.divf %181, %182 : vector<2x32xf32>
    %184 = vector.extract_strided_slice %173 {offsets = [0, 32], sizes = [2, 32], strides = [1, 1]} : vector<2x96xf32> to vector<2x32xf32>
    %185 = vector.extract_strided_slice %175 {offsets = [0, 32], sizes = [2, 32], strides = [1, 1]} : vector<2x96xf32> to vector<2x32xf32>
    %186 = arith.addf %184, %185 : vector<2x32xf32>
    %187 = arith.negf %186 : vector<2x32xf32>
    %188 = math.exp %187 : vector<2x32xf32>
    %cst_30 = arith.constant 1.000000e+00 : f32
    %189 = vector.broadcast %cst_30 : f32 to vector<2x32xf32>
    %190 = arith.addf %189, %188 : vector<2x32xf32>
    %191 = arith.divf %189, %190 : vector<2x32xf32>
    %192 = vector.extract_strided_slice %173 {offsets = [0, 64], sizes = [2, 32], strides = [1, 1]} : vector<2x96xf32> to vector<2x32xf32>
    %193 = vector.extract_strided_slice %175 {offsets = [0, 64], sizes = [2, 32], strides = [1, 1]} : vector<2x96xf32> to vector<2x32xf32>
    %194 = arith.mulf %183, %193 : vector<2x32xf32>
    %195 = arith.addf %192, %194 : vector<2x32xf32>
    %196 = math.tanh %195 : vector<2x32xf32>
    %cst_31 = arith.constant 1.000000e+00 : f32
    %197 = vector.broadcast %cst_31 : f32 to vector<2x32xf32>
    %198 = arith.subf %197, %191 : vector<2x32xf32>
    %199 = arith.mulf %198, %196 : vector<2x32xf32>
    %200 = arith.mulf %191, %172 : vector<2x32xf32>
    %201 = arith.addf %199, %200 : vector<2x32xf32>
    %202 = vector.extract_strided_slice %26 {offsets = [12, 0], sizes = [2, 96], strides = [1, 1]} : vector<16x96xf32> to vector<2x96xf32>
    %cst_32 = arith.constant dense<0.000000e+00> : vector<2x96xf32>
    %203 = tpu.matmul %201, %8, %cst_32 {dimension_numbers = #tpu.dot_dimension_numbers<[1], [0], [0], [1], [0, 0, 1, 1], [], []>} : vector<2x32xf32>, vector<32x96xf32>, vector<2x96xf32> -> vector<2x96xf32>
    %204 = arith.addf %203, %17 : vector<2x96xf32>
    %205 = vector.extract_strided_slice %202 {offsets = [0, 0], sizes = [2, 32], strides = [1, 1]} : vector<2x96xf32> to vector<2x32xf32>
    %206 = vector.extract_strided_slice %204 {offsets = [0, 0], sizes = [2, 32], strides = [1, 1]} : vector<2x96xf32> to vector<2x32xf32>
    %207 = arith.addf %205, %206 : vector<2x32xf32>
    %208 = arith.negf %207 : vector<2x32xf32>
    %209 = math.exp %208 : vector<2x32xf32>
    %cst_33 = arith.constant 1.000000e+00 : f32
    %210 = vector.broadcast %cst_33 : f32 to vector<2x32xf32>
    %211 = arith.addf %210, %209 : vector<2x32xf32>
    %212 = arith.divf %210, %211 : vector<2x32xf32>
    %213 = vector.extract_strided_slice %202 {offsets = [0, 32], sizes = [2, 32], strides = [1, 1]} : vector<2x96xf32> to vector<2x32xf32>
    %214 = vector.extract_strided_slice %204 {offsets = [0, 32], sizes = [2, 32], strides = [1, 1]} : vector<2x96xf32> to vector<2x32xf32>
    %215 = arith.addf %213, %214 : vector<2x32xf32>
    %216 = arith.negf %215 : vector<2x32xf32>
    %217 = math.exp %216 : vector<2x32xf32>
    %cst_34 = arith.constant 1.000000e+00 : f32
    %218 = vector.broadcast %cst_34 : f32 to vector<2x32xf32>
    %219 = arith.addf %218, %217 : vector<2x32xf32>
    %220 = arith.divf %218, %219 : vector<2x32xf32>
    %221 = vector.extract_strided_slice %202 {offsets = [0, 64], sizes = [2, 32], strides = [1, 1]} : vector<2x96xf32> to vector<2x32xf32>
    %222 = vector.extract_strided_slice %204 {offsets = [0, 64], sizes = [2, 32], strides = [1, 1]} : vector<2x96xf32> to vector<2x32xf32>
    %223 = arith.mulf %212, %222 : vector<2x32xf32>
    %224 = arith.addf %221, %223 : vector<2x32xf32>
    %225 = math.tanh %224 : vector<2x32xf32>
    %cst_35 = arith.constant 1.000000e+00 : f32
    %226 = vector.broadcast %cst_35 : f32 to vector<2x32xf32>
    %227 = arith.subf %226, %220 : vector<2x32xf32>
    %228 = arith.mulf %227, %225 : vector<2x32xf32>
    %229 = arith.mulf %220, %201 : vector<2x32xf32>
    %230 = arith.addf %228, %229 : vector<2x32xf32>
    %231 = vector.extract_strided_slice %26 {offsets = [14, 0], sizes = [2, 96], strides = [1, 1]} : vector<16x96xf32> to vector<2x96xf32>
    %cst_36 = arith.constant dense<0.000000e+00> : vector<2x96xf32>
    %232 = tpu.matmul %230, %8, %cst_36 {dimension_numbers = #tpu.dot_dimension_numbers<[1], [0], [0], [1], [0, 0, 1, 1], [], []>} : vector<2x32xf32>, vector<32x96xf32>, vector<2x96xf32> -> vector<2x96xf32>
    %233 = arith.addf %232, %17 : vector<2x96xf32>
    %234 = vector.extract_strided_slice %231 {offsets = [0, 0], sizes = [2, 32], strides = [1, 1]} : vector<2x96xf32> to vector<2x32xf32>
    %235 = vector.extract_strided_slice %233 {offsets = [0, 0], sizes = [2, 32], strides = [1, 1]} : vector<2x96xf32> to vector<2x32xf32>
    %236 = arith.addf %234, %235 : vector<2x32xf32>
    %237 = arith.negf %236 : vector<2x32xf32>
    %238 = math.exp %237 : vector<2x32xf32>
    %cst_37 = arith.constant 1.000000e+00 : f32
    %239 = vector.broadcast %cst_37 : f32 to vector<2x32xf32>
    %240 = arith.addf %239, %238 : vector<2x32xf32>
    %241 = arith.divf %239, %240 : vector<2x32xf32>
    %242 = vector.extract_strided_slice %231 {offsets = [0, 32], sizes = [2, 32], strides = [1, 1]} : vector<2x96xf32> to vector<2x32xf32>
    %243 = vector.extract_strided_slice %233 {offsets = [0, 32], sizes = [2, 32], strides = [1, 1]} : vector<2x96xf32> to vector<2x32xf32>
    %244 = arith.addf %242, %243 : vector<2x32xf32>
    %245 = arith.negf %244 : vector<2x32xf32>
    %246 = math.exp %245 : vector<2x32xf32>
    %cst_38 = arith.constant 1.000000e+00 : f32
    %247 = vector.broadcast %cst_38 : f32 to vector<2x32xf32>
    %248 = arith.addf %247, %246 : vector<2x32xf32>
    %249 = arith.divf %247, %248 : vector<2x32xf32>
    %250 = vector.extract_strided_slice %231 {offsets = [0, 64], sizes = [2, 32], strides = [1, 1]} : vector<2x96xf32> to vector<2x32xf32>
    %251 = vector.extract_strided_slice %233 {offsets = [0, 64], sizes = [2, 32], strides = [1, 1]} : vector<2x96xf32> to vector<2x32xf32>
    %252 = arith.mulf %241, %251 : vector<2x32xf32>
    %253 = arith.addf %250, %252 : vector<2x32xf32>
    %254 = math.tanh %253 : vector<2x32xf32>
    %cst_39 = arith.constant 1.000000e+00 : f32
    %255 = vector.broadcast %cst_39 : f32 to vector<2x32xf32>
    %256 = arith.subf %255, %249 : vector<2x32xf32>
    %257 = arith.mulf %256, %254 : vector<2x32xf32>
    %258 = arith.mulf %249, %230 : vector<2x32xf32>
    %259 = arith.addf %257, %258 : vector<2x32xf32>
    %260 = tpu.concatenate %56, %85, %114, %143, %172, %201, %230, %259 in 0 : vector<2x32xf32>, vector<2x32xf32>, vector<2x32xf32>, vector<2x32xf32>, vector<2x32xf32>, vector<2x32xf32>, vector<2x32xf32>, vector<2x32xf32> -> vector<16x32xf32>
    %cst_40 = arith.constant dense<0.000000e+00> : vector<12x32xf32>
    %261 = tpu.matmul %6, %13, %cst_40 {dimension_numbers = #tpu.dot_dimension_numbers<[1], [0], [0], [1], [0, 0, 1, 1], [], []>} : vector<12x32xf32>, vector<32x32xf32>, vector<12x32xf32> -> vector<12x32xf32>
    %262 = arith.addf %5, %261 : vector<12x32xf32>
    %263 = vector.broadcast %22 : vector<1x32xf32> to vector<12x32xf32>
    %264 = arith.addf %262, %263 : vector<12x32xf32>
    %cst_41 = arith.constant dense<0.000000e+00> : vector<12x96xf32>
    %265 = tpu.matmul %264, %9, %cst_41 {dimension_numbers = #tpu.dot_dimension_numbers<[1], [0], [0], [1], [0, 0, 1, 1], [], []>} : vector<12x32xf32>, vector<32x96xf32>, vector<12x96xf32> -> vector<12x96xf32>
    %266 = vector.broadcast %18 : vector<1x96xf32> to vector<12x96xf32>
    %267 = arith.addf %265, %266 : vector<12x96xf32>
    %268 = vector.extract_strided_slice %267 {offsets = [0, 0], sizes = [2, 96], strides = [1, 1]} : vector<12x96xf32> to vector<2x96xf32>
    %cst_42 = arith.constant dense<0.000000e+00> : vector<2x96xf32>
    %269 = tpu.matmul %259, %10, %cst_42 {dimension_numbers = #tpu.dot_dimension_numbers<[1], [0], [0], [1], [0, 0, 1, 1], [], []>} : vector<2x32xf32>, vector<32x96xf32>, vector<2x96xf32> -> vector<2x96xf32>
    %270 = arith.addf %269, %21 : vector<2x96xf32>
    %271 = vector.extract_strided_slice %268 {offsets = [0, 0], sizes = [2, 32], strides = [1, 1]} : vector<2x96xf32> to vector<2x32xf32>
    %272 = vector.extract_strided_slice %270 {offsets = [0, 0], sizes = [2, 32], strides = [1, 1]} : vector<2x96xf32> to vector<2x32xf32>
    %273 = arith.addf %271, %272 : vector<2x32xf32>
    %274 = arith.negf %273 : vector<2x32xf32>
    %275 = math.exp %274 : vector<2x32xf32>
    %cst_43 = arith.constant 1.000000e+00 : f32
    %276 = vector.broadcast %cst_43 : f32 to vector<2x32xf32>
    %277 = arith.addf %276, %275 : vector<2x32xf32>
    %278 = arith.divf %276, %277 : vector<2x32xf32>
    %279 = vector.extract_strided_slice %268 {offsets = [0, 32], sizes = [2, 32], strides = [1, 1]} : vector<2x96xf32> to vector<2x32xf32>
    %280 = vector.extract_strided_slice %270 {offsets = [0, 32], sizes = [2, 32], strides = [1, 1]} : vector<2x96xf32> to vector<2x32xf32>
    %281 = arith.addf %279, %280 : vector<2x32xf32>
    %282 = arith.negf %281 : vector<2x32xf32>
    %283 = math.exp %282 : vector<2x32xf32>
    %cst_44 = arith.constant 1.000000e+00 : f32
    %284 = vector.broadcast %cst_44 : f32 to vector<2x32xf32>
    %285 = arith.addf %284, %283 : vector<2x32xf32>
    %286 = arith.divf %284, %285 : vector<2x32xf32>
    %287 = vector.extract_strided_slice %268 {offsets = [0, 64], sizes = [2, 32], strides = [1, 1]} : vector<2x96xf32> to vector<2x32xf32>
    %288 = vector.extract_strided_slice %270 {offsets = [0, 64], sizes = [2, 32], strides = [1, 1]} : vector<2x96xf32> to vector<2x32xf32>
    %289 = arith.mulf %278, %288 : vector<2x32xf32>
    %290 = arith.addf %287, %289 : vector<2x32xf32>
    %291 = math.tanh %290 : vector<2x32xf32>
    %cst_45 = arith.constant 1.000000e+00 : f32
    %292 = vector.broadcast %cst_45 : f32 to vector<2x32xf32>
    %293 = arith.subf %292, %286 : vector<2x32xf32>
    %294 = arith.mulf %293, %291 : vector<2x32xf32>
    %295 = arith.mulf %286, %259 : vector<2x32xf32>
    %296 = arith.addf %294, %295 : vector<2x32xf32>
    %297 = vector.extract_strided_slice %267 {offsets = [2, 0], sizes = [2, 96], strides = [1, 1]} : vector<12x96xf32> to vector<2x96xf32>
    %cst_46 = arith.constant dense<0.000000e+00> : vector<2x96xf32>
    %298 = tpu.matmul %296, %10, %cst_46 {dimension_numbers = #tpu.dot_dimension_numbers<[1], [0], [0], [1], [0, 0, 1, 1], [], []>} : vector<2x32xf32>, vector<32x96xf32>, vector<2x96xf32> -> vector<2x96xf32>
    %299 = arith.addf %298, %21 : vector<2x96xf32>
    %300 = vector.extract_strided_slice %297 {offsets = [0, 0], sizes = [2, 32], strides = [1, 1]} : vector<2x96xf32> to vector<2x32xf32>
    %301 = vector.extract_strided_slice %299 {offsets = [0, 0], sizes = [2, 32], strides = [1, 1]} : vector<2x96xf32> to vector<2x32xf32>
    %302 = arith.addf %300, %301 : vector<2x32xf32>
    %303 = arith.negf %302 : vector<2x32xf32>
    %304 = math.exp %303 : vector<2x32xf32>
    %cst_47 = arith.constant 1.000000e+00 : f32
    %305 = vector.broadcast %cst_47 : f32 to vector<2x32xf32>
    %306 = arith.addf %305, %304 : vector<2x32xf32>
    %307 = arith.divf %305, %306 : vector<2x32xf32>
    %308 = vector.extract_strided_slice %297 {offsets = [0, 32], sizes = [2, 32], strides = [1, 1]} : vector<2x96xf32> to vector<2x32xf32>
    %309 = vector.extract_strided_slice %299 {offsets = [0, 32], sizes = [2, 32], strides = [1, 1]} : vector<2x96xf32> to vector<2x32xf32>
    %310 = arith.addf %308, %309 : vector<2x32xf32>
    %311 = arith.negf %310 : vector<2x32xf32>
    %312 = math.exp %311 : vector<2x32xf32>
    %cst_48 = arith.constant 1.000000e+00 : f32
    %313 = vector.broadcast %cst_48 : f32 to vector<2x32xf32>
    %314 = arith.addf %313, %312 : vector<2x32xf32>
    %315 = arith.divf %313, %314 : vector<2x32xf32>
    %316 = vector.extract_strided_slice %297 {offsets = [0, 64], sizes = [2, 32], strides = [1, 1]} : vector<2x96xf32> to vector<2x32xf32>
    %317 = vector.extract_strided_slice %299 {offsets = [0, 64], sizes = [2, 32], strides = [1, 1]} : vector<2x96xf32> to vector<2x32xf32>
    %318 = arith.mulf %307, %317 : vector<2x32xf32>
    %319 = arith.addf %316, %318 : vector<2x32xf32>
    %320 = math.tanh %319 : vector<2x32xf32>
    %cst_49 = arith.constant 1.000000e+00 : f32
    %321 = vector.broadcast %cst_49 : f32 to vector<2x32xf32>
    %322 = arith.subf %321, %315 : vector<2x32xf32>
    %323 = arith.mulf %322, %320 : vector<2x32xf32>
    %324 = arith.mulf %315, %296 : vector<2x32xf32>
    %325 = arith.addf %323, %324 : vector<2x32xf32>
    %326 = vector.extract_strided_slice %267 {offsets = [4, 0], sizes = [2, 96], strides = [1, 1]} : vector<12x96xf32> to vector<2x96xf32>
    %cst_50 = arith.constant dense<0.000000e+00> : vector<2x96xf32>
    %327 = tpu.matmul %325, %10, %cst_50 {dimension_numbers = #tpu.dot_dimension_numbers<[1], [0], [0], [1], [0, 0, 1, 1], [], []>} : vector<2x32xf32>, vector<32x96xf32>, vector<2x96xf32> -> vector<2x96xf32>
    %328 = arith.addf %327, %21 : vector<2x96xf32>
    %329 = vector.extract_strided_slice %326 {offsets = [0, 0], sizes = [2, 32], strides = [1, 1]} : vector<2x96xf32> to vector<2x32xf32>
    %330 = vector.extract_strided_slice %328 {offsets = [0, 0], sizes = [2, 32], strides = [1, 1]} : vector<2x96xf32> to vector<2x32xf32>
    %331 = arith.addf %329, %330 : vector<2x32xf32>
    %332 = arith.negf %331 : vector<2x32xf32>
    %333 = math.exp %332 : vector<2x32xf32>
    %cst_51 = arith.constant 1.000000e+00 : f32
    %334 = vector.broadcast %cst_51 : f32 to vector<2x32xf32>
    %335 = arith.addf %334, %333 : vector<2x32xf32>
    %336 = arith.divf %334, %335 : vector<2x32xf32>
    %337 = vector.extract_strided_slice %326 {offsets = [0, 32], sizes = [2, 32], strides = [1, 1]} : vector<2x96xf32> to vector<2x32xf32>
    %338 = vector.extract_strided_slice %328 {offsets = [0, 32], sizes = [2, 32], strides = [1, 1]} : vector<2x96xf32> to vector<2x32xf32>
    %339 = arith.addf %337, %338 : vector<2x32xf32>
    %340 = arith.negf %339 : vector<2x32xf32>
    %341 = math.exp %340 : vector<2x32xf32>
    %cst_52 = arith.constant 1.000000e+00 : f32
    %342 = vector.broadcast %cst_52 : f32 to vector<2x32xf32>
    %343 = arith.addf %342, %341 : vector<2x32xf32>
    %344 = arith.divf %342, %343 : vector<2x32xf32>
    %345 = vector.extract_strided_slice %326 {offsets = [0, 64], sizes = [2, 32], strides = [1, 1]} : vector<2x96xf32> to vector<2x32xf32>
    %346 = vector.extract_strided_slice %328 {offsets = [0, 64], sizes = [2, 32], strides = [1, 1]} : vector<2x96xf32> to vector<2x32xf32>
    %347 = arith.mulf %336, %346 : vector<2x32xf32>
    %348 = arith.addf %345, %347 : vector<2x32xf32>
    %349 = math.tanh %348 : vector<2x32xf32>
    %cst_53 = arith.constant 1.000000e+00 : f32
    %350 = vector.broadcast %cst_53 : f32 to vector<2x32xf32>
    %351 = arith.subf %350, %344 : vector<2x32xf32>
    %352 = arith.mulf %351, %349 : vector<2x32xf32>
    %353 = arith.mulf %344, %325 : vector<2x32xf32>
    %354 = arith.addf %352, %353 : vector<2x32xf32>
    %355 = vector.extract_strided_slice %267 {offsets = [6, 0], sizes = [2, 96], strides = [1, 1]} : vector<12x96xf32> to vector<2x96xf32>
    %cst_54 = arith.constant dense<0.000000e+00> : vector<2x96xf32>
    %356 = tpu.matmul %354, %10, %cst_54 {dimension_numbers = #tpu.dot_dimension_numbers<[1], [0], [0], [1], [0, 0, 1, 1], [], []>} : vector<2x32xf32>, vector<32x96xf32>, vector<2x96xf32> -> vector<2x96xf32>
    %357 = arith.addf %356, %21 : vector<2x96xf32>
    %358 = vector.extract_strided_slice %355 {offsets = [0, 0], sizes = [2, 32], strides = [1, 1]} : vector<2x96xf32> to vector<2x32xf32>
    %359 = vector.extract_strided_slice %357 {offsets = [0, 0], sizes = [2, 32], strides = [1, 1]} : vector<2x96xf32> to vector<2x32xf32>
    %360 = arith.addf %358, %359 : vector<2x32xf32>
    %361 = arith.negf %360 : vector<2x32xf32>
    %362 = math.exp %361 : vector<2x32xf32>
    %cst_55 = arith.constant 1.000000e+00 : f32
    %363 = vector.broadcast %cst_55 : f32 to vector<2x32xf32>
    %364 = arith.addf %363, %362 : vector<2x32xf32>
    %365 = arith.divf %363, %364 : vector<2x32xf32>
    %366 = vector.extract_strided_slice %355 {offsets = [0, 32], sizes = [2, 32], strides = [1, 1]} : vector<2x96xf32> to vector<2x32xf32>
    %367 = vector.extract_strided_slice %357 {offsets = [0, 32], sizes = [2, 32], strides = [1, 1]} : vector<2x96xf32> to vector<2x32xf32>
    %368 = arith.addf %366, %367 : vector<2x32xf32>
    %369 = arith.negf %368 : vector<2x32xf32>
    %370 = math.exp %369 : vector<2x32xf32>
    %cst_56 = arith.constant 1.000000e+00 : f32
    %371 = vector.broadcast %cst_56 : f32 to vector<2x32xf32>
    %372 = arith.addf %371, %370 : vector<2x32xf32>
    %373 = arith.divf %371, %372 : vector<2x32xf32>
    %374 = vector.extract_strided_slice %355 {offsets = [0, 64], sizes = [2, 32], strides = [1, 1]} : vector<2x96xf32> to vector<2x32xf32>
    %375 = vector.extract_strided_slice %357 {offsets = [0, 64], sizes = [2, 32], strides = [1, 1]} : vector<2x96xf32> to vector<2x32xf32>
    %376 = arith.mulf %365, %375 : vector<2x32xf32>
    %377 = arith.addf %374, %376 : vector<2x32xf32>
    %378 = math.tanh %377 : vector<2x32xf32>
    %cst_57 = arith.constant 1.000000e+00 : f32
    %379 = vector.broadcast %cst_57 : f32 to vector<2x32xf32>
    %380 = arith.subf %379, %373 : vector<2x32xf32>
    %381 = arith.mulf %380, %378 : vector<2x32xf32>
    %382 = arith.mulf %373, %354 : vector<2x32xf32>
    %383 = arith.addf %381, %382 : vector<2x32xf32>
    %384 = vector.extract_strided_slice %267 {offsets = [8, 0], sizes = [2, 96], strides = [1, 1]} : vector<12x96xf32> to vector<2x96xf32>
    %cst_58 = arith.constant dense<0.000000e+00> : vector<2x96xf32>
    %385 = tpu.matmul %383, %10, %cst_58 {dimension_numbers = #tpu.dot_dimension_numbers<[1], [0], [0], [1], [0, 0, 1, 1], [], []>} : vector<2x32xf32>, vector<32x96xf32>, vector<2x96xf32> -> vector<2x96xf32>
    %386 = arith.addf %385, %21 : vector<2x96xf32>
    %387 = vector.extract_strided_slice %384 {offsets = [0, 0], sizes = [2, 32], strides = [1, 1]} : vector<2x96xf32> to vector<2x32xf32>
    %388 = vector.extract_strided_slice %386 {offsets = [0, 0], sizes = [2, 32], strides = [1, 1]} : vector<2x96xf32> to vector<2x32xf32>
    %389 = arith.addf %387, %388 : vector<2x32xf32>
    %390 = arith.negf %389 : vector<2x32xf32>
    %391 = math.exp %390 : vector<2x32xf32>
    %cst_59 = arith.constant 1.000000e+00 : f32
    %392 = vector.broadcast %cst_59 : f32 to vector<2x32xf32>
    %393 = arith.addf %392, %391 : vector<2x32xf32>
    %394 = arith.divf %392, %393 : vector<2x32xf32>
    %395 = vector.extract_strided_slice %384 {offsets = [0, 32], sizes = [2, 32], strides = [1, 1]} : vector<2x96xf32> to vector<2x32xf32>
    %396 = vector.extract_strided_slice %386 {offsets = [0, 32], sizes = [2, 32], strides = [1, 1]} : vector<2x96xf32> to vector<2x32xf32>
    %397 = arith.addf %395, %396 : vector<2x32xf32>
    %398 = arith.negf %397 : vector<2x32xf32>
    %399 = math.exp %398 : vector<2x32xf32>
    %cst_60 = arith.constant 1.000000e+00 : f32
    %400 = vector.broadcast %cst_60 : f32 to vector<2x32xf32>
    %401 = arith.addf %400, %399 : vector<2x32xf32>
    %402 = arith.divf %400, %401 : vector<2x32xf32>
    %403 = vector.extract_strided_slice %384 {offsets = [0, 64], sizes = [2, 32], strides = [1, 1]} : vector<2x96xf32> to vector<2x32xf32>
    %404 = vector.extract_strided_slice %386 {offsets = [0, 64], sizes = [2, 32], strides = [1, 1]} : vector<2x96xf32> to vector<2x32xf32>
    %405 = arith.mulf %394, %404 : vector<2x32xf32>
    %406 = arith.addf %403, %405 : vector<2x32xf32>
    %407 = math.tanh %406 : vector<2x32xf32>
    %cst_61 = arith.constant 1.000000e+00 : f32
    %408 = vector.broadcast %cst_61 : f32 to vector<2x32xf32>
    %409 = arith.subf %408, %402 : vector<2x32xf32>
    %410 = arith.mulf %409, %407 : vector<2x32xf32>
    %411 = arith.mulf %402, %383 : vector<2x32xf32>
    %412 = arith.addf %410, %411 : vector<2x32xf32>
    %413 = vector.extract_strided_slice %267 {offsets = [10, 0], sizes = [2, 96], strides = [1, 1]} : vector<12x96xf32> to vector<2x96xf32>
    %cst_62 = arith.constant dense<0.000000e+00> : vector<2x96xf32>
    %414 = tpu.matmul %412, %10, %cst_62 {dimension_numbers = #tpu.dot_dimension_numbers<[1], [0], [0], [1], [0, 0, 1, 1], [], []>} : vector<2x32xf32>, vector<32x96xf32>, vector<2x96xf32> -> vector<2x96xf32>
    %415 = arith.addf %414, %21 : vector<2x96xf32>
    %416 = vector.extract_strided_slice %413 {offsets = [0, 0], sizes = [2, 32], strides = [1, 1]} : vector<2x96xf32> to vector<2x32xf32>
    %417 = vector.extract_strided_slice %415 {offsets = [0, 0], sizes = [2, 32], strides = [1, 1]} : vector<2x96xf32> to vector<2x32xf32>
    %418 = arith.addf %416, %417 : vector<2x32xf32>
    %419 = arith.negf %418 : vector<2x32xf32>
    %420 = math.exp %419 : vector<2x32xf32>
    %cst_63 = arith.constant 1.000000e+00 : f32
    %421 = vector.broadcast %cst_63 : f32 to vector<2x32xf32>
    %422 = arith.addf %421, %420 : vector<2x32xf32>
    %423 = arith.divf %421, %422 : vector<2x32xf32>
    %424 = vector.extract_strided_slice %413 {offsets = [0, 32], sizes = [2, 32], strides = [1, 1]} : vector<2x96xf32> to vector<2x32xf32>
    %425 = vector.extract_strided_slice %415 {offsets = [0, 32], sizes = [2, 32], strides = [1, 1]} : vector<2x96xf32> to vector<2x32xf32>
    %426 = arith.addf %424, %425 : vector<2x32xf32>
    %427 = arith.negf %426 : vector<2x32xf32>
    %428 = math.exp %427 : vector<2x32xf32>
    %cst_64 = arith.constant 1.000000e+00 : f32
    %429 = vector.broadcast %cst_64 : f32 to vector<2x32xf32>
    %430 = arith.addf %429, %428 : vector<2x32xf32>
    %431 = arith.divf %429, %430 : vector<2x32xf32>
    %432 = vector.extract_strided_slice %413 {offsets = [0, 64], sizes = [2, 32], strides = [1, 1]} : vector<2x96xf32> to vector<2x32xf32>
    %433 = vector.extract_strided_slice %415 {offsets = [0, 64], sizes = [2, 32], strides = [1, 1]} : vector<2x96xf32> to vector<2x32xf32>
    %434 = arith.mulf %423, %433 : vector<2x32xf32>
    %435 = arith.addf %432, %434 : vector<2x32xf32>
    %436 = math.tanh %435 : vector<2x32xf32>
    %cst_65 = arith.constant 1.000000e+00 : f32
    %437 = vector.broadcast %cst_65 : f32 to vector<2x32xf32>
    %438 = arith.subf %437, %431 : vector<2x32xf32>
    %439 = arith.mulf %438, %436 : vector<2x32xf32>
    %440 = arith.mulf %431, %412 : vector<2x32xf32>
    %441 = arith.addf %439, %440 : vector<2x32xf32>
    %442 = tpu.concatenate %296, %325, %354, %383, %412, %441 in 0 : vector<2x32xf32>, vector<2x32xf32>, vector<2x32xf32>, vector<2x32xf32>, vector<2x32xf32>, vector<2x32xf32> -> vector<12x32xf32>
    %cst_66 = arith.constant dense<0.000000e+00> : vector<12x16xf32>
    %443 = tpu.matmul %442, %260, %cst_66 {dimension_numbers = #tpu.dot_dimension_numbers<[1], [1], [0], [0], [0, 0, 1, 0], [], []>} : vector<12x32xf32>, vector<16x32xf32>, vector<12x16xf32> -> vector<12x16xf32>
    %444 = tpu.iota {dimensions = array<i32: 0>} : vector<12x16xi32>
    %c2_i32 = arith.constant 2 : i32
    %c0_i32 = arith.constant 0 : i32
    %445 = arith.cmpi eq, %c2_i32, %c0_i32 : i32
    %c1_i32 = arith.constant 1 : i32
    %446 = arith.select %445, %c1_i32, %c2_i32 : i32
    %447 = vector.broadcast %446 : i32 to vector<12x16xi32>
    %448 = arith.remsi %444, %447 : vector<12x16xi32>
    %c0_i32_67 = arith.constant 0 : i32
    %449 = vector.broadcast %c0_i32_67 : i32 to vector<12x16xi32>
    %450 = arith.cmpi ne, %448, %449 : vector<12x16xi32>
    %c0_i32_68 = arith.constant 0 : i32
    %451 = vector.broadcast %c0_i32_68 : i32 to vector<12x16xi32>
    %452 = arith.cmpi slt, %448, %451 : vector<12x16xi32>
    %c0_i32_69 = arith.constant 0 : i32
    %453 = arith.cmpi slt, %446, %c0_i32_69 : i32
    %454 = vector.broadcast %453 : i1 to vector<12x16xi1>
    %455 = vector.broadcast %454 : vector<12x16xi1> to vector<12x16xi1>
    %456 = arith.xori %452, %455 : vector<12x16xi1>
    %457 = arith.andi %456, %450 : vector<12x16xi1>
    %458 = vector.broadcast %446 : i32 to vector<12x16xi32>
    %459 = arith.addi %448, %458 : vector<12x16xi32>
    %460 = arith.select %457, %459, %448 : vector<12x16xi1>, vector<12x16xi32>
    %461 = tpu.iota {dimensions = array<i32: 1>} : vector<12x16xi32>
    %c2_i32_70 = arith.constant 2 : i32
    %c0_i32_71 = arith.constant 0 : i32
    %462 = arith.cmpi eq, %c2_i32_70, %c0_i32_71 : i32
    %c1_i32_72 = arith.constant 1 : i32
    %463 = arith.select %462, %c1_i32_72, %c2_i32_70 : i32
    %464 = vector.broadcast %463 : i32 to vector<12x16xi32>
    %465 = arith.remsi %461, %464 : vector<12x16xi32>
    %c0_i32_73 = arith.constant 0 : i32
    %466 = vector.broadcast %c0_i32_73 : i32 to vector<12x16xi32>
    %467 = arith.cmpi ne, %465, %466 : vector<12x16xi32>
    %c0_i32_74 = arith.constant 0 : i32
    %468 = vector.broadcast %c0_i32_74 : i32 to vector<12x16xi32>
    %469 = arith.cmpi slt, %465, %468 : vector<12x16xi32>
    %c0_i32_75 = arith.constant 0 : i32
    %470 = arith.cmpi slt, %463, %c0_i32_75 : i32
    %471 = vector.broadcast %470 : i1 to vector<12x16xi1>
    %472 = vector.broadcast %471 : vector<12x16xi1> to vector<12x16xi1>
    %473 = arith.xori %469, %472 : vector<12x16xi1>
    %474 = arith.andi %473, %467 : vector<12x16xi1>
    %475 = vector.broadcast %463 : i32 to vector<12x16xi32>
    %476 = arith.addi %465, %475 : vector<12x16xi32>
    %477 = arith.select %474, %476, %465 : vector<12x16xi1>, vector<12x16xi32>
    %478 = arith.cmpi eq, %460, %477 : vector<12x16xi32>
    %cst_76 = arith.constant -1.000000e+30 : f32
    %479 = vector.broadcast %cst_76 : f32 to vector<12x16xf32>
    %480 = arith.select %478, %443, %479 : vector<12x16xi1>, vector<12x16xf32>
    %cst_77 = arith.constant dense<0xFF800000> : vector<12xf32>
    %481 = vector.multi_reduction <maximumf>, %480, %cst_77 [1] : vector<12x16xf32> to vector<12xf32>
    %482 = vector.shape_cast %481 : vector<12xf32> to vector<12x1xf32>
    %483 = vector.broadcast %482 : vector<12x1xf32> to vector<12x16xf32>
    %484 = arith.subf %480, %483 : vector<12x16xf32>
    %485 = math.exp %484 : vector<12x16xf32>
    %cst_78 = arith.constant dense<0.000000e+00> : vector<12xf32>
    %486 = vector.multi_reduction <add>, %485, %cst_78 [1] : vector<12x16xf32> to vector<12xf32>
    %487 = vector.shape_cast %486 : vector<12xf32> to vector<12x1xf32>
    %488 = tpu.reciprocal %487 {approx = true} : vector<12x1xf32> -> vector<12x1xf32>
    %489 = vector.broadcast %488 : vector<12x1xf32> to vector<12x16xf32>
    %490 = arith.mulf %485, %489 : vector<12x16xf32>
    %cst_79 = arith.constant dense<0.000000e+00> : vector<12x32xf32>
    %491 = tpu.matmul %490, %260, %cst_79 {dimension_numbers = #tpu.dot_dimension_numbers<[1], [0], [0], [1], [0, 0, 1, 1], [], []>} : vector<12x16xf32>, vector<16x32xf32>, vector<12x32xf32> -> vector<12x32xf32>
    %492 = tpu.concatenate %442, %491 in 1 : vector<12x32xf32>, vector<12x32xf32> -> vector<12x64xf32>
    %cst_80 = arith.constant dense<0.000000e+00> : vector<12x32xf32>
    %493 = tpu.matmul %492, %11, %cst_80 {dimension_numbers = #tpu.dot_dimension_numbers<[1], [0], [0], [1], [0, 0, 1, 1], [], []>} : vector<12x64xf32>, vector<64x32xf32>, vector<12x32xf32> -> vector<12x32xf32>
    %494 = math.tanh %493 : vector<12x32xf32>
    %cst_81 = arith.constant dense<0.000000e+00> : vector<12x32xf32>
    %495 = tpu.matmul %494, %12, %cst_81 {dimension_numbers = #tpu.dot_dimension_numbers<[1], [0], [0], [1], [0, 0, 1, 1], [], []>} : vector<12x32xf32>, vector<32x32xf32>, vector<12x32xf32> -> vector<12x32xf32>
    %496 = vector.broadcast %23 : vector<1x32xf32> to vector<12x32xf32>
    %497 = arith.addf %495, %496 : vector<12x32xf32>
    %498 = vector.extract_strided_slice %497 {offsets = [0, 0], sizes = [12, 16], strides = [1, 1]} : vector<12x32xf32> to vector<12x16xf32>
    %cst_82 = arith.constant dense<0xFF800000> : vector<12xf32>
    %499 = vector.multi_reduction <maximumf>, %498, %cst_82 [1] : vector<12x16xf32> to vector<12xf32>
    %500 = vector.shape_cast %499 : vector<12xf32> to vector<12x1xf32>
    %501 = vector.broadcast %500 : vector<12x1xf32> to vector<12x16xf32>
    %502 = arith.subf %498, %501 : vector<12x16xf32>
    %503 = math.exp %502 : vector<12x16xf32>
    %cst_83 = arith.constant dense<0.000000e+00> : vector<12xf32>
    %504 = vector.multi_reduction <add>, %503, %cst_83 [1] : vector<12x16xf32> to vector<12xf32>
    %505 = vector.shape_cast %504 : vector<12xf32> to vector<12x1xf32>
    %506 = math.log %505 : vector<12x1xf32>
    %507 = arith.addf %500, %506 : vector<12x1xf32>
    %508 = vector.broadcast %507 : vector<12x1xf32> to vector<12x16xf32>
    %509 = arith.subf %498, %508 : vector<12x16xf32>
    %510 = vector.extract_strided_slice %497 {offsets = [0, 16], sizes = [12, 4], strides = [1, 1]} : vector<12x32xf32> to vector<12x4xf32>
    %511 = arith.negf %510 : vector<12x4xf32>
    %512 = math.exp %511 : vector<12x4xf32>
    %cst_84 = arith.constant 1.000000e+00 : f32
    %513 = vector.broadcast %cst_84 : f32 to vector<12x4xf32>
    %514 = arith.addf %513, %512 : vector<12x4xf32>
    %515 = arith.divf %513, %514 : vector<12x4xf32>
    %516 = tpu.concatenate %509, %515 in 1 : vector<12x16xf32>, vector<12x4xf32> -> vector<12x20xf32>
    %c0_85 = arith.constant 0 : index
    %c0_86 = arith.constant 0 : index
    %517 = vector.load %arg4[%c0_85, %c0_86] : memref<12x20xf32, #tpu.memory_space<vmem>>, vector<12x20xf32>
    tpu.vector_store %arg4[%c0_85, %c0_86], %516 {strides = array<i32>} : memref<12x20xf32, #tpu.memory_space<vmem>>, vector<12x20xf32>,
    return
  }
}

</mosaic_0001>

<bundles_post_ra>
// kernel: tpu_custom_call.1
= control target key start
LH: loop header
LB: loop body
LE: loop exit
PB: predicated region body
PF: predicated region fallthrough
CT: control target
= control target key end

     0   :  { %v2973_v3 = vmov 0.0|0.0   ;;  %vm2974_vm0 = vmmov 0   ;;  %v2975_v8 = vmov 0.0   ;;  %vm68_vm1 = vcmask 261120   ;;  %s3455_s0 = inlined_call_operand.vmem [shape: f32[40,32], index: 0, kind: input, shape index: {}]   ;;  %s3456_s1 = inlined_call_operand.vmem [shape: f32[128,96], index: 1, kind: input, shape index: {}]   ;;  %s3457_s2 = inlined_call_operand.vmem [shape: f32[128,32], index: 2, kind: input, shape index: {}]   ;;  %s3458_s3 = inlined_call_operand.vmem [shape: f32[8,96], index: 3, kind: input, shape index: {}]   ;;  %s3459_s4 = inlined_call_operand.hbm [shape: f32[12,20], index: 4, kind: output, shape index: {}]  }
   0x1   :  { %v23_v0 = vld [vmem:[%s3456_s1] sm:$0xff]  ;;  %v24_v1 = vld [vmem:[%s3456_s1 + $0x8] sm:$0xff]  ;;  %2688 = vmatprep.subr.bf16.mxu1 %v2973_v3  ;;  %v25_v6 = vld [vmem:[%s3456_s1 + $0x10] sm:$0xff]  ;;  %2468 = vmatprep.mubr.msk.f32.mxu1 %vm2974_vm0, %v2975_v8 }
   0x2   :  { %v27_v2 = vld [vmem:[%s3456_s1 + $0x20] sm:$0xff]  ;;  %v2680_v4 = vpack.c.bf16 %v24_v1, %v23_v0  ;;  %v28_v5 = vld [vmem:[%s3456_s1 + $0x28] sm:$0xff]  ;;  %v26_v7 = vld [vmem:[%s3456_s1 + $0x18] sm:$0xff] }
   0x3   :  { %v3028_v9 = vpack.c.bf16 %v28_v5, %v27_v2  ;;  %v2684_v10 = vpack.c.bf16 %v26_v7, %v25_v6  ;;  %v29_v11 = vld [vmem:[%s3456_s1 + $0x30] sm:$0xff]  ;;  %v30_v12 = vld [vmem:[%s3456_s1 + $0x38] sm:$0xff]  ;;  %v18_v13 = vld [vmem:[%s3455_s0] sm:$0xff] }
   0x4   :  { %2681 = vmatprep.subr.bf16.mxu0 %v2680_v4  ;;  %2457 = vmatprep.mubr.msk.f32.mxu0 %vm68_vm1, %v18_v13 }
   0x5   :  { %9 = vsyncpa [#allocation3], 0  ;;  %2690 = vmatpush3.bf16.msra.mxu1 %v3028_v9  ;;  %2683 = vmatpush3.bf16.msra.mxu0 %v2680_v4  ;;  %v3041_v14 = vpack.c.bf16 %v30_v12, %v29_v11  ;;  %v19_v15 = vld [vmem:[%s3455_s0 + $0x8] sm:$0xff]  ;;  %v56_v16 = vlaneseq  ;;  %v3071_v19 = vld [vmem:[%s3458_s3] sm:$0xff]  ;;  %s2976_s11 = smov 64   ;;  %s2977_s12 = smov 96  }
   0x6   :  { %2691 = vmatprep.subr.bf16.mxu1 %v2973_v3  ;;  %2685 = vmatprep.subr.bf16.mxu0 %v2684_v10  ;;  %vm986_vm2 = vcmask 1041408   ;;  %vm988_vm3 = vcmask 1043456   ;;  %vm990_vm4 = vcmask 1045504   ;;  %vm2789_vm5 = vmpackc.low %vm68_vm1, %vm68_vm1  ;;  %vm1948_vm8 = vcmask 125952   ;;  %s2978_s5 = smov 32  }
   0x7   :  { %v3065_v17 = vshrl.u32 %v56_v16, 7  ;;  %vm1944_vm9 = vcmask 130048   ;;  %vm2063_vm10 = vcmask 523264   ;;  %vm2274_vm11 = vcmask 158720  }
   0x8   :  { %vm2272_vm12 = vcmask 162816  }
   0x9   :  { %2693 = vmatpush3.bf16.msra.mxu1 %v3041_v14  ;;  %2687 = vmatpush3.bf16.msra.mxu0 %v2684_v10  ;;  %v58_v18 = vsub.s32 1, %v3065_v17  ;;  %v66_v20 = vsub.s32 0, %v3065_v17 }
   0xa   :  { %2694 = vmatprep.subr.bf16.mxu0 %v2973_v3  ;;  %2700 = vmatprep.subr.bf16.mxu1 %v2973_v3 }
   0xb   :  { %v3075_v21 = vrot.slane %v3071_v19, %v58_v18  ;;  %v67_v22 = vrot.slane %v3071_v19, %v66_v20 }
   0xc   :  { %2469 = vmatmul.mubr.f32.vlgmr.msra.gmra.mrb[0].mxu1 %v2975_v8  ;;  %2458 = vmatmul.mubr.msk.f32.vlgmr.msra.gmra.mrb[0].mxu0 %vm68_vm1, %v19_v15 }
   0xd   :  { %2696 = vmatpush3.bf16.msra.mxu0 %v3028_v9  ;;  %2479 = vmatprep.mubr.msk.f32.mxu0 %vm2974_vm0, %v2975_v8 }
   0xe   :  { %2697 = vmatprep.subr.bf16.mxu0 %v2973_v3  ;;  %2702 = vmatpush3.bf16.msra.mxu1 %v3028_v9 }
   0xf   :  { %2703 = vmatprep.subr.bf16.mxu1 %v2973_v3  ;;  %2490 = vmatprep.mubr.msk.f32.mxu1 %vm2974_vm0, %v2975_v8 }
  0x11   :  { %2699 = vmatpush3.bf16.msra.mxu0 %v3041_v14 }
  0x12   :  { %2705 = vmatpush3.bf16.msra.mxu1 %v3041_v14  ;;  %2706 = vmatprep.subr.bf16.mxu0 %v2973_v3 }
  0x13   :  { %2712 = vmatprep.subr.bf16.mxu1 %v2973_v3 }
  0xdf   :  { %v219_v23 = vpop.f32.mrb[0].mxu1  ;;  %v2459_v24 = vpop.f32.mrb[0].mxu0 }
  0xe0   :  { %v220_v25 = vadd.f32 %v219_v23, %v3075_v21  ;;  %v3079_v26 = vadd.f32 %v2459_v24, %v67_v22  ;;  %v2470_v27 = vpop.f32.mrb[1].mxu1  ;;  %v141_v28 = vpop.f32.mrb[1].mxu0 }
  0xe1   :  { %v3082_v29 = vadd.f32 %v141_v28, %v67_v22 }
  0xe2   :  { %231 = vrot.lane.b32.xlu0 %v220_v25, %s2976_s11 }
  0xe3   :  { %v223_v30 = vadd.f32 %v220_v25, %v3082_v29 }
  0xe5   :  { %v2294_v31 = vmul.f32 -1.442695, %v223_v30 }
  0xe7   :  { %2836 = vpow2.f32 %v2294_v31 }
  0xf1   :  { %v2837_v32 = vpop.eup %2836 }
  0xf2   :  { %v227_v33 = vadd.f32 1.0, %v2837_v32 }
  0xf4   :  { %2838 = vrcp.f32 %v227_v33 }
  0xfe   :  { %v2839_v34 = vpop.eup %2838 }
  0xff   :  { %v241_v40 = vsub.f32 1.0, %v2839_v34  ;;  %v247_v42 = vmul.f32 0.0, %v2839_v34 }
 0x154   :  { %v232_v35 = vpop.permute.xlu0 %231 }
 0x155   :  { %v234_v36 = vmul.f32 %v2839_v34, %v232_v35 }
 0x157   :  { %236 = vrot.lane.b32.xlu0 %v234_v36, %s2976_s11 }
 0x1c9   :  { %v237_v37 = vpop.permute.xlu0 %236 }
 0x1ca   :  { %v239_v38 = vadd.f32 %v237_v37, %v3082_v29 }
 0x1cc   :  { %2840 = vtanh.f32 %v239_v38 }
 0x1d6   :  { %v2841_v39 = vpop.eup %2840 }
 0x1d7   :  { %243 = vrot.lane.b32.xlu1 %v2841_v39, %s2977_s12 }
 0x249   :  { %v244_v41 = vpop.permute.xlu1 %243 }
 0x24a   :  { %v246_v43 = vmul.f32 %v244_v41, %v241_v40 }
 0x24c   :  { %v3088_v44 = vadd.f32 %v247_v42, %v246_v43 }
 0x24e   :  { %250 = vrot.lane.b32.xlu1 %v3088_v44, %s2977_s12  ;;  %v350_v61 = vrot.slane %v3088_v44, 6 }
 0x2c0   :  { %v251_v45 = vpop.permute.xlu1 %250 }
 0x2c1   :  { %2480 = vmatmul.mubr.msk.f32.vlgmr.msra.gmra.mrb[2].mxu0 %vm68_vm1, %v251_v45 }
 0x2c2   :  { %2708 = vmatpush3.bf16.msra.mxu0 %v3028_v9  ;;  %2501 = vmatprep.mubr.msk.f32.mxu0 %vm2974_vm0, %v2975_v8 }
 0x2c3   :  { %2709 = vmatprep.subr.bf16.mxu0 %v2973_v3 }
 0x2c6   :  { %2711 = vmatpush3.bf16.msra.mxu0 %v3041_v14 }
 0x2c7   :  { %2718 = vmatprep.subr.bf16.mxu0 %v2973_v3 }
 0x394   :  { %v320_v46 = vpop.f32.mrb[2].mxu0 }
 0x395   :  { %v321_v47 = vadd.f32 %v320_v46, %v3075_v21  ;;  %v2481_v48 = vpop.f32.mrb[3].mxu0 }
 0x397   :  { %v325_v49 = vrot.slane %v321_v47, 6 }
 0x399   :  { %334 = vrot.lane.b32.xlu0 %v325_v49, %s2976_s11  ;;  %v327_v50 = vadd.f32 %v325_v49, %v3082_v29 }
 0x39b   :  { %v2296_v51 = vmul.f32 -1.442695, %v327_v50 }
 0x39d   :  { %2842 = vpow2.f32 %v2296_v51 }
 0x3a7   :  { %v2843_v52 = vpop.eup %2842 }
 0x3a8   :  { %v331_v53 = vadd.f32 1.0, %v2843_v52 }
 0x3aa   :  { %2844 = vrcp.f32 %v331_v53 }
 0x3b4   :  { %v2845_v54 = vpop.eup %2844 }
 0x3b5   :  { %v344_v60 = vsub.f32 1.0, %v2845_v54  ;;  %v352_v0 = vmul.f32 %v2845_v54, %v350_v61 }
 0x40b   :  { %v335_v55 = vpop.permute.xlu0 %334 }
 0x40c   :  { %v337_v56 = vmul.f32 %v2845_v54, %v335_v55 }
 0x40e   :  { %339 = vrot.lane.b32.xlu1 %v337_v56, %s2976_s11 }
 0x480   :  { %v340_v57 = vpop.permute.xlu1 %339 }
 0x481   :  { %v342_v58 = vadd.f32 %v340_v57, %v3082_v29 }
 0x483   :  { %2846 = vtanh.f32 %v342_v58 }
 0x48d   :  { %v2847_v59 = vpop.eup %2846 }
 0x48e   :  { %346 = vrot.lane.b32.xlu0 %v2847_v59, %s2977_s12 }
 0x500   :  { %v347_v62 = vpop.permute.xlu0 %346 }
 0x501   :  { %v349_v63 = vmul.f32 %v347_v62, %v344_v60 }
 0x503   :  { %v353_v1 = vadd.f32 %v352_v0, %v349_v63 }
 0x505   :  { %v355_v2 = vrot.slane %v353_v1, 2  ;;  %v456_v28 = vrot.slane %v353_v1, 6  ;;  %v987_v34 = vsel %vm986_vm2, %v3088_v44, %v353_v1 }
 0x507   :  { %356 = vrot.lane.b32.xlu1 %v355_v2, %s2977_s12 }
 0x579   :  { %v357_v4 = vpop.permute.xlu1 %356 }
 0x57a   :  { %2491 = vmatmul.mubr.msk.f32.vlgmr.msra.gmra.mrb[2].mxu1 %vm68_vm1, %v357_v4 }
 0x57b   :  { %2714 = vmatpush3.bf16.msra.mxu1 %v3028_v9  ;;  %2512 = vmatprep.mubr.msk.f32.mxu1 %vm2974_vm0, %v2975_v8 }
 0x57c   :  { %2715 = vmatprep.subr.bf16.mxu1 %v2973_v3 }
 0x57f   :  { %2717 = vmatpush3.bf16.msra.mxu1 %v3041_v14 }
 0x580   :  { %2724 = vmatprep.subr.bf16.mxu1 %v2973_v3 }
 0x64d   :  { %v426_v5 = vpop.f32.mrb[2].mxu1 }
 0x64e   :  { %v427_v6 = vadd.f32 %v426_v5, %v3075_v21  ;;  %v2492_v7 = vpop.f32.mrb[3].mxu1 }
 0x650   :  { %v431_v10 = vrot.slane %v427_v6, 4 }
 0x652   :  { %440 = vrot.lane.b32.xlu0 %v431_v10, %s2976_s11  ;;  %v433_v11 = vadd.f32 %v431_v10, %v3082_v29 }
 0x654   :  { %v2298_v12 = vmul.f32 -1.442695, %v433_v11 }
 0x656   :  { %2848 = vpow2.f32 %v2298_v12 }
 0x660   :  { %v2849_v13 = vpop.eup %2848 }
 0x661   :  { %v437_v15 = vadd.f32 1.0, %v2849_v13 }
 0x663   :  { %2850 = vrcp.f32 %v437_v15 }
 0x66d   :  { %v2851_v18 = vpop.eup %2850 }
 0x66e   :  { %v450_v27 = vsub.f32 1.0, %v2851_v18  ;;  %v458_v31 = vmul.f32 %v2851_v18, %v456_v28 }
 0x6c4   :  { %v441_v20 = vpop.permute.xlu0 %440 }
 0x6c5   :  { %v443_v22 = vmul.f32 %v2851_v18, %v441_v20 }
 0x6c7   :  { %445 = vrot.lane.b32.xlu1 %v443_v22, %s2976_s11 }
 0x739   :  { %v446_v23 = vpop.permute.xlu1 %445 }
 0x73a   :  { %v448_v24 = vadd.f32 %v446_v23, %v3082_v29 }
 0x73c   :  { %2852 = vtanh.f32 %v448_v24 }
 0x746   :  { %v2853_v25 = vpop.eup %2852 }
 0x747   :  { %452 = vrot.lane.b32.xlu0 %v2853_v25, %s2977_s12 }
 0x7b9   :  { %v453_v30 = vpop.permute.xlu0 %452 }
 0x7ba   :  { %v455_v32 = vmul.f32 %v453_v30, %v450_v27 }
 0x7bc   :  { %v459_v33 = vadd.f32 %v458_v31, %v455_v32 }
 0x7be   :  { %v989_v35 = vsel %vm988_vm3, %v987_v34, %v459_v33  ;;  %v461_v36 = vrot.slane %v459_v33, 4  ;;  %v562_v53 = vrot.slane %v459_v33, 6 }
 0x7c0   :  { %462 = vrot.lane.b32.xlu1 %v461_v36, %s2977_s12 }
 0x832   :  { %v463_v37 = vpop.permute.xlu1 %462 }
 0x833   :  { %2502 = vmatmul.mubr.msk.f32.vlgmr.msra.gmra.mrb[4].mxu0 %vm68_vm1, %v463_v37 }
 0x834   :  { %2720 = vmatpush3.bf16.msra.mxu0 %v3028_v9  ;;  %2523 = vmatprep.mubr.msk.f32.mxu0 %vm2974_vm0, %v2975_v8 }
 0x835   :  { %2721 = vmatprep.subr.bf16.mxu0 %v2973_v3 }
 0x838   :  { %2723 = vmatpush3.bf16.msra.mxu0 %v3041_v14 }
 0x839   :  { %2730 = vmatprep.subr.bf16.mxu0 %v2973_v3 }
 0x906   :  { %v532_v38 = vpop.f32.mrb[4].mxu0 }
 0x907   :  { %v533_v39 = vadd.f32 %v532_v38, %v3075_v21  ;;  %v2503_v40 = vpop.f32.mrb[5].mxu0 }
 0x909   :  { %v537_v41 = vrot.slane %v533_v39, 2 }
 0x90b   :  { %546 = vrot.lane.b32.xlu0 %v537_v41, %s2976_s11  ;;  %v539_v42 = vadd.f32 %v537_v41, %v3082_v29 }
 0x90d   :  { %v2300_v43 = vmul.f32 -1.442695, %v539_v42 }
 0x90f   :  { %2854 = vpow2.f32 %v2300_v43 }
 0x919   :  { %v2855_v44 = vpop.eup %2854 }
 0x91a   :  { %v543_v45 = vadd.f32 1.0, %v2855_v44 }
 0x91c   :  { %2856 = vrcp.f32 %v543_v45 }
 0x926   :  { %v2857_v46 = vpop.eup %2856 }
 0x927   :  { %v556_v52 = vsub.f32 1.0, %v2857_v46  ;;  %v564_v55 = vmul.f32 %v2857_v46, %v562_v53 }
 0x97d   :  { %v547_v47 = vpop.permute.xlu0 %546 }
 0x97e   :  { %v549_v48 = vmul.f32 %v2857_v46, %v547_v47 }
 0x980   :  { %551 = vrot.lane.b32.xlu1 %v549_v48, %s2976_s11 }
 0x9f2   :  { %v552_v49 = vpop.permute.xlu1 %551 }
 0x9f3   :  { %v554_v50 = vadd.f32 %v552_v49, %v3082_v29 }
 0x9f5   :  { %2858 = vtanh.f32 %v554_v50 }
 0x9ff   :  { %v2859_v51 = vpop.eup %2858 }
 0xa00   :  { %558 = vrot.lane.b32.xlu0 %v2859_v51, %s2977_s12 }
 0xa72   :  { %v559_v54 = vpop.permute.xlu0 %558 }
 0xa73   :  { %v561_v56 = vmul.f32 %v559_v54, %v556_v52 }
 0xa75   :  { %v565_v57 = vadd.f32 %v564_v55, %v561_v56 }
 0xa77   :  { %v567_v58 = vrot.slane %v565_v57, 6  ;;  %v3138_v59 = vsel %vm990_vm4, %v989_v35, %v565_v57 }
 0xa79   :  { %568 = vrot.lane.b32.xlu1 %v567_v58, %s2977_s12 }
 0xaeb   :  { %v569_v60 = vpop.permute.xlu1 %568 }
 0xaec   :  { %2513 = vmatmul.mubr.msk.f32.vlgmr.msra.gmra.mrb[4].mxu1 %vm68_vm1, %v569_v60 }
 0xaed   :  { %2726 = vmatpush3.bf16.msra.mxu1 %v3028_v9  ;;  %2534 = vmatprep.mubr.msk.f32.mxu1 %vm2974_vm0, %v2975_v8 }
 0xaee   :  { %2727 = vmatprep.subr.bf16.mxu1 %v2973_v3 }
 0xaf1   :  { %2729 = vmatpush3.bf16.msra.mxu1 %v3041_v14 }
 0xbbf   :  { %v638_v29 = vpop.f32.mrb[4].mxu1 }
 0xbc0   :  { %v639_v61 = vadd.f32 %v638_v29, %v3075_v21  ;;  %v2514_v62 = vpop.f32.mrb[5].mxu1 }
 0xbc2   :  { %650 = vrot.lane.b32.xlu0 %v639_v61, %s2976_s11  ;;  %v642_v63 = vadd.f32 %v639_v61, %v3079_v26 }
 0xbc4   :  { %v2302_v0 = vmul.f32 -1.442695, %v642_v63 }
 0xbc6   :  { %2860 = vpow2.f32 %v2302_v0 }
 0xbd0   :  { %v2861_v1 = vpop.eup %2860 }
 0xbd1   :  { %v646_v2 = vadd.f32 1.0, %v2861_v1 }
 0xbd3   :  { %2862 = vrcp.f32 %v646_v2 }
 0xbdd   :  { %v2863_v4 = vpop.eup %2862 }
 0xbde   :  { %v660_v12 = vsub.f32 1.0, %v2863_v4  ;;  %v667_v15 = vmul.f32 %v2863_v4, %v567_v58 }
 0xc34   :  { %v651_v5 = vpop.permute.xlu0 %650 }
 0xc35   :  { %v653_v6 = vmul.f32 %v2863_v4, %v651_v5 }
 0xc37   :  { %655 = vrot.lane.b32.xlu1 %v653_v6, %s2976_s11 }
 0xca9   :  { %v656_v7 = vpop.permute.xlu1 %655 }
 0xcaa   :  { %v658_v10 = vadd.f32 %v656_v7, %v3079_v26 }
 0xcac   :  { %2864 = vtanh.f32 %v658_v10 }
 0xcb6   :  { %v2865_v11 = vpop.eup %2864 }
 0xcb7   :  { %662 = vrot.lane.b32.xlu0 %v2865_v11, %s2977_s12 }
 0xd29   :  { %v663_v13 = vpop.permute.xlu0 %662 }
 0xd2a   :  { %v665_v18 = vmul.f32 %v663_v13, %v660_v12 }
 0xd2c   :  { %v3153_v20 = vadd.f32 %v667_v15, %v665_v18 }
 0xd2e   :  { %670 = vrot.lane.b32.xlu1 %v3153_v20, %s2977_s12  ;;  %v770_v38 = vrot.slane %v3153_v20, 6 }
 0xda0   :  { %v671_v22 = vpop.permute.xlu1 %670 }
 0xda1   :  { %2524 = vmatmul.mubr.msk.f32.vlgmr.msra.gmra.mrb[6].mxu0 %vm68_vm1, %v671_v22 }
 0xda2   :  { %2732 = vmatpush3.bf16.msra.mxu0 %v3028_v9  ;;  %2545 = vmatprep.mubr.msk.f32.mxu0 %vm2974_vm0, %v2975_v8 }
 0xda3   :  { %2733 = vmatprep.subr.bf16.mxu0 %v2973_v3 }
 0xda6   :  { %2735 = vmatpush3.bf16.msra.mxu0 %v3041_v14 }
 0xe74   :  { %v740_v23 = vpop.f32.mrb[6].mxu0 }
 0xe75   :  { %v741_v24 = vadd.f32 %v740_v23, %v3075_v21  ;;  %v2525_v25 = vpop.f32.mrb[7].mxu0 }
 0xe76   :  { %v53_v25 = vld [vmem:[%s3457_s2 + $0x70] sm:$0xff] }
 0xe77   :  { %v745_v27 = vrot.slane %v741_v24, 6  ;;  %v52_v24 = vld [vmem:[%s3457_s2 + $0x68] sm:$0xff] }
 0xe79   :  { %754 = vrot.lane.b32.xlu0 %v745_v27, %s2976_s11  ;;  %v747_v28 = vadd.f32 %v745_v27, %v3079_v26 }
 0xe7b   :  { %v2304_v30 = vmul.f32 -1.442695, %v747_v28  ;;  %v54_v28 = vld [vmem:[%s3457_s2 + $0x78] sm:$0xff] }
 0xe7d   :  { %2866 = vpow2.f32 %v2304_v30  ;;  %v21_v30 = vld [vmem:[%s3455_s0 + $0x18] sm:$0xff] }
 0xe87   :  { %v2867_v31 = vpop.eup %2866 }
 0xe88   :  { %v751_v9 = vadd.f32 1.0, %v2867_v31  ;;  %v22_v31 = vld [vmem:[%s3455_s0 + $0x20] sm:$0xff] }
 0xe8a   :  { %2868 = vrcp.f32 %v751_v9  ;;  %v2740_v9 = vpack.c.bf16 %v54_v28, %v53_v25 }
 0xe94   :  { %v2869_v32 = vpop.eup %2868 }
 0xe95   :  { %v764_v37 = vsub.f32 1.0, %v2869_v32  ;;  %v772_v41 = vmul.f32 %v2869_v32, %v770_v38 }
 0xeeb   :  { %v755_v33 = vpop.permute.xlu0 %754 }
 0xeec   :  { %v757_v34 = vmul.f32 %v2869_v32, %v755_v33  ;;  %v997_v32 = vrot.slane %v21_v30, 4  ;;  %v998_v33 = vrot.slane %v22_v31, 4 }
 0xeee   :  { %759 = vrot.lane.b32.xlu1 %v757_v34, %s2976_s11  ;;  %v999_v34 = vsel %vm988_vm3, %v997_v32, %v998_v33 }
 0xf60   :  { %v760_v14 = vpop.permute.xlu1 %759 }
 0xf61   :  { %v762_v35 = vadd.f32 %v760_v14, %v3079_v26 }
 0xf63   :  { %2870 = vtanh.f32 %v762_v35 }
 0xf6d   :  { %v2871_v36 = vpop.eup %2870 }
 0xf6e   :  { %766 = vrot.lane.b32.xlu0 %v2871_v36, %s2977_s12  ;;  %v31_v36 = vld [vmem:[%s3456_s1 + $0x40] sm:$0xff] }
 0xfe0   :  { %v767_v39 = vpop.permute.xlu0 %766 }
 0xfe1   :  { %v769_v40 = vmul.f32 %v767_v39, %v764_v37  ;;  %v32_v37 = vld [vmem:[%s3456_s1 + $0x48] sm:$0xff]  ;;  %v35_v39 = vld [vmem:[%s3456_s1 + $0x60] sm:$0xff] }
 0xfe2   :  { %v2744_v38 = vpack.c.bf16 %v32_v37, %v31_v36 }
 0xfe3   :  { %v773_v42 = vadd.f32 %v772_v41, %v769_v40  ;;  %v36_v40 = vld [vmem:[%s3456_s1 + $0x68] sm:$0xff] }
 0xfe4   :  { %v3236_v41 = vpack.c.bf16 %v36_v40, %v35_v39  ;;  %2745 = vmatprep.subr.bf16.mxu0 %v2744_v38 }
 0xfe5   :  { %v775_v43 = vrot.slane %v773_v42, 2  ;;  %v876_v29 = vrot.slane %v773_v42, 6  ;;  %v992_v1 = vsel %vm986_vm2, %v3153_v20, %v773_v42  ;;  %v34_v42 = vld [vmem:[%s3456_s1 + $0x58] sm:$0xff] }
 0xfe7   :  { %776 = vrot.lane.b32.xlu1 %v775_v43, %s2977_s12  ;;  %v37_v43 = vld [vmem:[%s3456_s1 + $0x70] sm:$0xff] }
0x1059   :  { %v777_v44 = vpop.permute.xlu1 %776 }
0x105a   :  { %2535 = vmatmul.mubr.msk.f32.vlgmr.msra.gmra.mrb[6].mxu1 %vm68_vm1, %v777_v44  ;;  %v38_v44 = vld [vmem:[%s3456_s1 + $0x78] sm:$0xff] }
0x105b   :  { %2556 = vmatprep.mubr.msk.f32.mxu1 %vm68_vm1, %v999_v34 }
0x112d   :  { %v846_v45 = vpop.f32.mrb[6].mxu1 }
0x112e   :  { %v847_v46 = vadd.f32 %v846_v45, %v3075_v21  ;;  %v2536_v47 = vpop.f32.mrb[7].mxu1 }
0x1130   :  { %v851_v48 = vrot.slane %v847_v46, 4  ;;  %v3248_v46 = vpack.c.bf16 %v38_v44, %v37_v43 }
0x1132   :  { %860 = vrot.lane.b32.xlu0 %v851_v48, %s2976_s11  ;;  %v853_v49 = vadd.f32 %v851_v48, %v3079_v26  ;;  %v1083_v48 = vsub.s32 4, %v3065_v17 }
0x1134   :  { %v2306_v50 = vmul.f32 -1.442695, %v853_v49  ;;  %v1084_v49 = vrot.slane %v3071_v19, %v1083_v48 }
0x1136   :  { %2872 = vpow2.f32 %v2306_v50  ;;  %v20_v50 = vld [vmem:[%s3455_s0 + $0x10] sm:$0xff] }
0x1140   :  { %v2873_v51 = vpop.eup %2872 }
0x1141   :  { %v857_v52 = vadd.f32 1.0, %v2873_v51 }
0x1143   :  { %2874 = vrcp.f32 %v857_v52 }
0x114d   :  { %v2875_v53 = vpop.eup %2874 }
0x114e   :  { %v870_v60 = vsub.f32 1.0, %v2875_v53  ;;  %v878_v62 = vmul.f32 %v2875_v53, %v876_v29 }
0x11a4   :  { %v861_v54 = vpop.permute.xlu0 %860 }
0x11a5   :  { %v863_v55 = vmul.f32 %v2875_v53, %v861_v54 }
0x11a7   :  { %865 = vrot.lane.b32.xlu1 %v863_v55, %s2976_s11 }
0x1219   :  { %v866_v56 = vpop.permute.xlu1 %865 }
0x121a   :  { %v868_v57 = vadd.f32 %v866_v56, %v3079_v26 }
0x121c   :  { %2876 = vtanh.f32 %v868_v57 }
0x1226   :  { %v2877_v58 = vpop.eup %2876 }
0x1227   :  { %872 = vrot.lane.b32.xlu0 %v2877_v58, %s2977_s12 }
0x1299   :  { %v873_v61 = vpop.permute.xlu0 %872 }
0x129a   :  { %v875_v63 = vmul.f32 %v873_v61, %v870_v60 }
0x129c   :  { %v3178_v0 = vadd.f32 %v878_v62, %v875_v63 }
0x129e   :  { %v3184_v2 = vsel %vm988_vm3, %v992_v1, %v3178_v0  ;;  %v881_v4 = vrot.slane %v3178_v0, 4  ;;  %v982_v58 = vrot.slane %v3178_v0, 6  ;;  %v1089_v0 = vsub.s32 2, %v3065_v17 }
0x12a0   :  { %882 = vrot.lane.b32.xlu1 %v881_v4, %s2977_s12 }
0x1312   :  { %v883_v5 = vpop.permute.xlu1 %882 }
0x1313   :  { %2546 = vmatmul.mubr.msk.f32.vlgmr.msra.gmra.mrb[8].mxu0 %vm68_vm1, %v883_v5 }
0x1314   :  { %2747 = vmatpush3.bf16.msra.mxu0 %v2744_v38 }
0x13e6   :  { %v952_v6 = vpop.f32.mrb[8].mxu0 }
0x13e7   :  { %v953_v7 = vadd.f32 %v952_v6, %v3075_v21  ;;  %v2547_v10 = vpop.f32.mrb[9].mxu0  ;;  %v51_v21 = vld [vmem:[%s3457_s2 + $0x60] sm:$0xff] }
0x13e8   :  { %v2736_v27 = vpack.c.bf16 %v52_v24, %v51_v21 }
0x13e9   :  { %v957_v11 = vrot.slane %v953_v7, 2 }
0x13ea   :  { %2737 = vmatprep.subr.bf16.mxu1 %v2736_v27 }
0x13eb   :  { %966 = vrot.lane.b32.xlu0 %v957_v11, %s2976_s11  ;;  %v959_v12 = vadd.f32 %v957_v11, %v3079_v26  ;;  %2739 = vmatpush3.bf16.msra.mxu1 %v2736_v27  ;;  %v62_v11 = vsub.s32 3, %v3065_v17 }
0x13ec   :  { %2741 = vmatprep.subr.bf16.mxu1 %v2740_v9 }
0x13ed   :  { %v2308_v13 = vmul.f32 -1.442695, %v959_v12  ;;  %v3291_v12 = vrot.slane %v3071_v19, %v62_v11 }
0x13ef   :  { %2878 = vpow2.f32 %v2308_v13  ;;  %2743 = vmatpush3.bf16.msra.mxu1 %v2740_v9 }
0x13f0   :  { %2752 = vmatprep.subr.bf16.mxu1 %v2973_v3 }
0x13f2   :  { %2557 = vmatmul.mubr.msk.f32.vlgmr.msra.gmra.mrb[8].mxu1 %vm68_vm1, %v998_v33 }
0x13f3   :  { %2578 = vmatprep.mubr.msk.f32.mxu1 %vm2974_vm0, %v2975_v8  ;;  %2754 = vmatpush3.bf16.msra.mxu1 %v3236_v41 }
0x13f4   :  { %2755 = vmatprep.subr.bf16.mxu1 %v2973_v3 }
0x13f7   :  { %2757 = vmatpush3.bf16.msra.mxu1 %v3248_v46 }
0x13f8   :  { %2764 = vmatprep.subr.bf16.mxu1 %v2973_v3 }
0x13f9   :  { %v2879_v15 = vpop.eup %2878 }
0x13fa   :  { %v963_v18 = vadd.f32 1.0, %v2879_v15 }
0x13fc   :  { %2880 = vrcp.f32 %v963_v18 }
0x1406   :  { %v3192_v20 = vpop.eup %2880 }
0x1407   :  { %v976_v57 = vsub.f32 1.0, %v3192_v20  ;;  %v984_v29 = vmul.f32 %v3192_v20, %v982_v58 }
0x145d   :  { %v967_v22 = vpop.permute.xlu0 %966 }
0x145e   :  { %v969_v23 = vmul.f32 %v3192_v20, %v967_v22 }
0x1460   :  { %971 = vrot.lane.b32.xlu1 %v969_v23, %s2976_s11 }
0x14c5   :  { %v2558_v51 = vpop.f32.mrb[8].mxu1 }
0x14c6   :  { %v1080_v52 = vadd.f32 %v2558_v51, %v21_v30  ;;  %v1070_v53 = vpop.f32.mrb[9].mxu1 }
0x14c7   :  { %v1079_v54 = vadd.f32 %v1070_v53, %v20_v50 }
0x14c8   :  { %v1086_v55 = vadd.f32 %v1084_v49, %v1080_v52 }
0x14c9   :  { %v1085_v56 = vadd.f32 %v1084_v49, %v1079_v54 }
0x14cb   :  { %2567 = vmatprep.mubr.msk.f32.mxu0 %vm68_vm1, %v1085_v56 }
0x14d2   :  { %v972_v14 = vpop.permute.xlu1 %971 }
0x14d3   :  { %v974_v35 = vadd.f32 %v972_v14, %v3079_v26  ;;  %v33_v26 = vld [vmem:[%s3456_s1 + $0x50] sm:$0xff] }
0x14d4   :  { %v2748_v45 = vpack.c.bf16 %v34_v42, %v33_v26 }
0x14d5   :  { %2882 = vtanh.f32 %v974_v35 }
0x14d6   :  { %2749 = vmatprep.subr.bf16.mxu0 %v2748_v45 }
0x14d7   :  { %2751 = vmatpush3.bf16.msra.mxu0 %v2748_v45 }
0x14d8   :  { %2758 = vmatprep.subr.bf16.mxu0 %v2973_v3 }
0x14da   :  { %2568 = vmatmul.mubr.msk.f32.vlgmr.msra.gmra.mrb[10].mxu0 %vm68_vm1, %v1086_v55 }
0x14db   :  { %2760 = vmatpush3.bf16.msra.mxu0 %v3236_v41  ;;  %2589 = vmatprep.mubr.msk.f32.mxu0 %vm2974_vm0, %v2975_v8 }
0x14dc   :  { %2761 = vmatprep.subr.bf16.mxu0 %v2973_v3 }
0x14df   :  { %v2883_v47 = vpop.eup %2882  ;;  %2763 = vmatpush3.bf16.msra.mxu0 %v3248_v46 }
0x14e0   :  { %978 = vrot.lane.b32.xlu0 %v2883_v47, %s2977_s12  ;;  %2770 = vmatprep.subr.bf16.mxu0 %v2973_v3 }
0x1552   :  { %v979_v60 = vpop.permute.xlu0 %978 }
0x1553   :  { %v981_v61 = vmul.f32 %v979_v60, %v976_v57 }
0x1555   :  { %v985_v62 = vadd.f32 %v984_v29, %v981_v61 }
0x1557   :  { %v1173_v63 = vrot.slane %v985_v62, 6  ;;  %v3273_v1 = vsel %vm990_vm4, %v3184_v2, %v985_v62  ;;  %v1090_v2 = vrot.slane %v3071_v19, %v1089_v0 }
0x1558   :  { %v2831_v4 = vpack.i.bf16 %v3273_v1, %v3138_v59 }
0x1559   :  { %1174 = vrot.lane.b32.xlu1 %v1173_v63, %s2977_s12 }
0x15ad   :  { %v2569_v6 = vpop.f32.mrb[10].mxu0 }
0x15ae   :  { %v3287_v7 = vadd.f32 %v2569_v6, %v1090_v2  ;;  %v1163_v10 = vpop.f32.mrb[11].mxu0 }
0x15af   :  { %v3295_v20 = vadd.f32 %v1163_v10, %v1090_v2 }
0x15cb   :  { %v1175_v5 = vpop.permute.xlu1 %1174 }
0x15cc   :  { %2579 = vmatmul.mubr.msk.f32.vlgmr.msra.gmra.mrb[10].mxu1 %vm68_vm1, %v1175_v5 }
0x15cd   :  { %2766 = vmatpush3.bf16.msra.mxu1 %v3236_v41  ;;  %2600 = vmatprep.mubr.msk.f32.mxu1 %vm2974_vm0, %v2975_v8 }
0x15ce   :  { %2767 = vmatprep.subr.bf16.mxu1 %v2973_v3 }
0x15d1   :  { %2769 = vmatpush3.bf16.msra.mxu1 %v3248_v46 }
0x15d2   :  { %2776 = vmatprep.subr.bf16.mxu1 %v2973_v3 }
0x169f   :  { %v1244_v13 = vpop.f32.mrb[10].mxu1 }
0x16a0   :  { %v1245_v15 = vadd.f32 %v1244_v13, %v3291_v12  ;;  %v2580_v18 = vpop.f32.mrb[11].mxu1 }
0x16a2   :  { %1256 = vrot.lane.b32.xlu0 %v1245_v15, %s2976_s11  ;;  %v1248_v22 = vadd.f32 %v1245_v15, %v3295_v20 }
0x16a4   :  { %v2314_v23 = vmul.f32 -1.442695, %v1248_v22 }
0x16a6   :  { %2884 = vpow2.f32 %v2314_v23 }
0x16b0   :  { %v2885_v21 = vpop.eup %2884 }
0x16b1   :  { %v1252_v24 = vadd.f32 1.0, %v2885_v21 }
0x16b3   :  { %2886 = vrcp.f32 %v1252_v24 }
0x16bd   :  { %v2887_v25 = vpop.eup %2886 }
0x16be   :  { %v1266_v9 = vsub.f32 1.0, %v2887_v25  ;;  %v1273_v33 = vmul.f32 %v2887_v25, %v1173_v63 }
0x1714   :  { %v1257_v27 = vpop.permute.xlu0 %1256 }
0x1715   :  { %v1259_v28 = vmul.f32 %v2887_v25, %v1257_v27 }
0x1717   :  { %1261 = vrot.lane.b32.xlu1 %v1259_v28, %s2976_s11 }
0x1789   :  { %v1262_v19 = vpop.permute.xlu1 %1261 }
0x178a   :  { %v1264_v30 = vadd.f32 %v1262_v19, %v3295_v20 }
0x178c   :  { %2888 = vtanh.f32 %v1264_v30 }
0x1796   :  { %v2889_v31 = vpop.eup %2888 }
0x1797   :  { %1268 = vrot.lane.b32.xlu0 %v2889_v31, %s2977_s12 }
0x1809   :  { %v1269_v32 = vpop.permute.xlu0 %1268 }
0x180a   :  { %v1271_v34 = vmul.f32 %v1269_v32, %v1266_v9 }
0x180c   :  { %v3301_v14 = vadd.f32 %v1273_v33, %v1271_v34 }
0x180e   :  { %1276 = vrot.lane.b32.xlu1 %v3301_v14, %s2977_s12  ;;  %v1376_v52 = vrot.slane %v3301_v14, 6 }
0x1880   :  { %v1277_v35 = vpop.permute.xlu1 %1276 }
0x1881   :  { %2590 = vmatmul.mubr.msk.f32.vlgmr.msra.gmra.mrb[12].mxu0 %vm68_vm1, %v1277_v35 }
0x1882   :  { %2772 = vmatpush3.bf16.msra.mxu0 %v3236_v41  ;;  %2611 = vmatprep.mubr.msk.f32.mxu0 %vm2974_vm0, %v2975_v8 }
0x1883   :  { %2773 = vmatprep.subr.bf16.mxu0 %v2973_v3 }
0x1886   :  { %2775 = vmatpush3.bf16.msra.mxu0 %v3248_v46 }
0x1887   :  { %2782 = vmatprep.subr.bf16.mxu0 %v2973_v3 }
0x1954   :  { %v1346_v36 = vpop.f32.mrb[12].mxu0 }
0x1955   :  { %v1347_v37 = vadd.f32 %v1346_v36, %v3291_v12  ;;  %v2591_v38 = vpop.f32.mrb[13].mxu0 }
0x1957   :  { %v1351_v39 = vrot.slane %v1347_v37, 6 }
0x1959   :  { %1360 = vrot.lane.b32.xlu0 %v1351_v39, %s2976_s11  ;;  %v1353_v40 = vadd.f32 %v1351_v39, %v3295_v20 }
0x195b   :  { %v2316_v26 = vmul.f32 -1.442695, %v1353_v40 }
0x195d   :  { %2890 = vpow2.f32 %v2316_v26 }
0x1967   :  { %v2891_v42 = vpop.eup %2890 }
0x1968   :  { %v1357_v43 = vadd.f32 1.0, %v2891_v42 }
0x196a   :  { %2892 = vrcp.f32 %v1357_v43 }
0x1974   :  { %v2893_v44 = vpop.eup %2892 }
0x1975   :  { %v1370_v51 = vsub.f32 1.0, %v2893_v44  ;;  %v1378_v55 = vmul.f32 %v2893_v44, %v1376_v52 }
0x19cb   :  { %v1361_v45 = vpop.permute.xlu0 %1360 }
0x19cc   :  { %v1363_v47 = vmul.f32 %v2893_v44, %v1361_v45 }
0x19ce   :  { %1365 = vrot.lane.b32.xlu1 %v1363_v47, %s2976_s11 }
0x1a40   :  { %v1366_v48 = vpop.permute.xlu1 %1365 }
0x1a41   :  { %v1368_v49 = vadd.f32 %v1366_v48, %v3295_v20 }
0x1a43   :  { %2894 = vtanh.f32 %v1368_v49 }
0x1a4d   :  { %v2895_v50 = vpop.eup %2894 }
0x1a4e   :  { %1372 = vrot.lane.b32.xlu0 %v2895_v50, %s2977_s12 }
0x1ac0   :  { %v1373_v53 = vpop.permute.xlu0 %1372 }
0x1ac1   :  { %v1375_v54 = vmul.f32 %v1373_v53, %v1370_v51 }
0x1ac3   :  { %v1379_v56 = vadd.f32 %v1378_v55, %v1375_v54 }
0x1ac5   :  { %v1381_v57 = vrot.slane %v1379_v56, 2  ;;  %v1482_v23 = vrot.slane %v1379_v56, 6  ;;  %v1800_v28 = vsel %vm986_vm2, %v3301_v14, %v1379_v56 }
0x1ac7   :  { %1382 = vrot.lane.b32.xlu1 %v1381_v57, %s2977_s12 }
0x1b39   :  { %v1383_v58 = vpop.permute.xlu1 %1382 }
0x1b3a   :  { %2601 = vmatmul.mubr.msk.f32.vlgmr.msra.gmra.mrb[12].mxu1 %vm68_vm1, %v1383_v58 }
0x1b3b   :  { %2778 = vmatpush3.bf16.msra.mxu1 %v3236_v41  ;;  %2622 = vmatprep.mubr.msk.f32.mxu1 %vm2974_vm0, %v2975_v8 }
0x1b3c   :  { %2779 = vmatprep.subr.bf16.mxu1 %v2973_v3 }
0x1b3f   :  { %2781 = vmatpush3.bf16.msra.mxu1 %v3248_v46 }
0x1c0d   :  { %v1452_v60 = vpop.f32.mrb[12].mxu1 }
0x1c0e   :  { %v1453_v29 = vadd.f32 %v1452_v60, %v3291_v12  ;;  %v2602_v61 = vpop.f32.mrb[13].mxu1 }
0x1c10   :  { %v1457_v62 = vrot.slane %v1453_v29, 4 }
0x1c12   :  { %1466 = vrot.lane.b32.xlu0 %v1457_v62, %s2976_s11  ;;  %v1459_v63 = vadd.f32 %v1457_v62, %v3295_v20 }
0x1c14   :  { %v2318_v5 = vmul.f32 -1.442695, %v1459_v63 }
0x1c16   :  { %2896 = vpow2.f32 %v2318_v5 }
0x1c20   :  { %v2897_v0 = vpop.eup %2896 }
0x1c21   :  { %v1463_v2 = vadd.f32 1.0, %v2897_v0 }
0x1c23   :  { %2898 = vrcp.f32 %v1463_v2 }
0x1c2d   :  { %v2899_v6 = vpop.eup %2898 }
0x1c2e   :  { %v1476_v22 = vsub.f32 1.0, %v2899_v6  ;;  %v1484_v24 = vmul.f32 %v2899_v6, %v1482_v23 }
0x1c84   :  { %v1467_v10 = vpop.permute.xlu0 %1466 }
0x1c85   :  { %v1469_v11 = vmul.f32 %v2899_v6, %v1467_v10 }
0x1c87   :  { %1471 = vrot.lane.b32.xlu1 %v1469_v11, %s2976_s11 }
0x1cf9   :  { %v1472_v13 = vpop.permute.xlu1 %1471 }
0x1cfa   :  { %v1474_v15 = vadd.f32 %v1472_v13, %v3295_v20 }
0x1cfc   :  { %2900 = vtanh.f32 %v1474_v15 }
0x1d06   :  { %v2901_v18 = vpop.eup %2900 }
0x1d07   :  { %1478 = vrot.lane.b32.xlu0 %v2901_v18, %s2977_s12 }
0x1d79   :  { %v1479_v21 = vpop.permute.xlu0 %1478 }
0x1d7a   :  { %v1481_v25 = vmul.f32 %v1479_v21, %v1476_v22 }
0x1d7c   :  { %v1485_v27 = vadd.f32 %v1484_v24, %v1481_v25 }
0x1d7e   :  { %v1487_v19 = vrot.slane %v1485_v27, 4  ;;  %v1801_v30 = vsel %vm988_vm3, %v1800_v28, %v1485_v27  ;;  %v1588_v26 = vrot.slane %v1485_v27, 6 }
0x1d80   :  { %1488 = vrot.lane.b32.xlu1 %v1487_v19, %s2977_s12 }
0x1df2   :  { %v1489_v31 = vpop.permute.xlu1 %1488 }
0x1df3   :  { %2612 = vmatmul.mubr.msk.f32.vlgmr.msra.gmra.mrb[14].mxu0 %vm68_vm1, %v1489_v31 }
0x1df4   :  { %2784 = vmatpush3.bf16.msra.mxu0 %v3236_v41  ;;  %2633 = vmatprep.mubr.msk.f32.mxu0 %vm2974_vm0, %v2975_v8 }
0x1df5   :  { %2785 = vmatprep.subr.bf16.mxu0 %v2973_v3 }
0x1df8   :  { %2787 = vmatpush3.bf16.msra.mxu0 %v3248_v46 }
0x1ec6   :  { %v1558_v9 = vpop.f32.mrb[14].mxu0 }
0x1ec7   :  { %v1559_v32 = vadd.f32 %v1558_v9, %v3291_v12  ;;  %v2613_v33 = vpop.f32.mrb[15].mxu0 }
0x1ec9   :  { %v1563_v34 = vrot.slane %v1559_v32, 2 }
0x1ecb   :  { %1572 = vrot.lane.b32.xlu0 %v1563_v34, %s2976_s11  ;;  %v1565_v14 = vadd.f32 %v1563_v34, %v3295_v20 }
0x1ecd   :  { %v2320_v35 = vmul.f32 -1.442695, %v1565_v14 }
0x1ecf   :  { %2902 = vpow2.f32 %v2320_v35 }
0x1ed9   :  { %v2903_v36 = vpop.eup %2902 }
0x1eda   :  { %v1569_v41 = vadd.f32 1.0, %v2903_v36 }
0x1edc   :  { %2904 = vrcp.f32 %v1569_v41  ;;  %v1901_v41 = vadd.s32 8, %v3065_v17 }
0x1ee6   :  { %v2905_v37 = vpop.eup %2904 }
0x1ee7   :  { %v1582_v40 = vsub.f32 1.0, %v2905_v37  ;;  %v1590_v43 = vmul.f32 %v2905_v37, %v1588_v26 }
0x1f3d   :  { %v1573_v8 = vpop.permute.xlu0 %1572 }
0x1f3e   :  { %v1575_v38 = vmul.f32 %v2905_v37, %v1573_v8  ;;  %v1927_v37 = vand.u32 127, %v56_v16  ;;  %v1913_v8 = vand.u32 1, %v1901_v41 }
0x1f40   :  { %1577 = vrot.lane.b32.xlu1 %v1575_v38, %s2976_s11  ;;  %v1932_v38 = vand.u32 1, %v1927_v37 }
0x1f42   :  { %vm1941_vm6 = vcmp.eq.s32.totalorder %v1913_v8, %v1932_v38 }
0x1fb2   :  { %v1578_v3 = vpop.permute.xlu1 %1577 }
0x1fb3   :  { %v1580_v46 = vadd.f32 %v1578_v3, %v3295_v20  ;;  %v1906_v3 = vand.u32 1, %v3065_v17 }
0x1fb5   :  { %2906 = vtanh.f32 %v1580_v46  ;;  %vm1940_vm7 = vcmp.eq.s32.totalorder %v1906_v3, %v1932_v38 }
0x1fbf   :  { %v2907_v39 = vpop.eup %2906 }
0x1fc0   :  { %1584 = vrot.lane.b32.xlu0 %v2907_v39, %s2977_s12 }
0x2032   :  { %v1585_v42 = vpop.permute.xlu0 %1584 }
0x2033   :  { %v1587_v44 = vmul.f32 %v1585_v42, %v1582_v40 }
0x2035   :  { %v1591_v45 = vadd.f32 %v1590_v43, %v1587_v44 }
0x2037   :  { %v1593_v47 = vrot.slane %v1591_v45, 6  ;;  %v1802_v48 = vsel %vm990_vm4, %v1801_v30, %v1591_v45 }
0x2039   :  { %1594 = vrot.lane.b32.xlu1 %v1593_v47, %s2977_s12 }
0x20ab   :  { %v1595_v49 = vpop.permute.xlu1 %1594 }
0x20ac   :  { %2623 = vmatmul.mubr.msk.f32.vlgmr.msra.gmra.mrb[14].mxu1 %vm68_vm1, %v1595_v49 }
0x217f   :  { %v1664_v50 = vpop.f32.mrb[14].mxu1 }
0x2180   :  { %v1665_v20 = vadd.f32 %v1664_v50, %v3291_v12  ;;  %v2624_v51 = vpop.f32.mrb[15].mxu1 }
0x2182   :  { %1676 = vrot.lane.b32.xlu0 %v1665_v20, %s2976_s11  ;;  %v1668_v52 = vadd.f32 %v1665_v20, %v3287_v7 }
0x2184   :  { %v2322_v53 = vmul.f32 -1.442695, %v1668_v52 }
0x2186   :  { %2908 = vpow2.f32 %v2322_v53 }
0x2190   :  { %v2909_v54 = vpop.eup %2908 }
0x2191   :  { %v1672_v55 = vadd.f32 1.0, %v2909_v54 }
0x2193   :  { %2910 = vrcp.f32 %v1672_v55 }
0x219d   :  { %v2911_v56 = vpop.eup %2910 }
0x219e   :  { %v1686_v62 = vsub.f32 1.0, %v2911_v56  ;;  %v1693_v5 = vmul.f32 %v2911_v56, %v1593_v47 }
0x21f4   :  { %v1677_v57 = vpop.permute.xlu0 %1676 }
0x21f5   :  { %v1679_v58 = vmul.f32 %v2911_v56, %v1677_v57 }
0x21f7   :  { %1681 = vrot.lane.b32.xlu1 %v1679_v58, %s2976_s11 }
0x2269   :  { %v1682_v60 = vpop.permute.xlu1 %1681 }
0x226a   :  { %v1684_v29 = vadd.f32 %v1682_v60, %v3287_v7  ;;  %v39_v60 = vld [vmem:[%s3457_s2] sm:$0xff] }
0x226c   :  { %2912 = vtanh.f32 %v1684_v29  ;;  %v40_v29 = vld [vmem:[%s3457_s2 + $0x8] sm:$0xff] }
0x2276   :  { %v2913_v61 = vpop.eup %2912 }
0x2277   :  { %1688 = vrot.lane.b32.xlu0 %v2913_v61, %s2977_s12  ;;  %v41_v61 = vld [vmem:[%s3457_s2 + $0x10] sm:$0xff] }
0x22e9   :  { %v1689_v63 = vpop.permute.xlu0 %1688 }
0x22ea   :  { %v1691_v0 = vmul.f32 %v1689_v63, %v1686_v62  ;;  %v2798_v62 = vpack.c.bf16 %v40_v29, %v39_v60  ;;  %v42_v63 = vld [vmem:[%s3457_s2 + $0x18] sm:$0xff] }
0x22ec   :  { %v1694_v2 = vadd.f32 %v1693_v5, %v1691_v0  ;;  %v2802_v5 = vpack.c.bf16 %v42_v63, %v41_v61  ;;  %v43_v0 = vld [vmem:[%s3457_s2 + $0x20] sm:$0xff] }
0x22ee   :  { %1696 = vrot.lane.b32.xlu1 %v1694_v2, %s2977_s12  ;;  %v1796_v1 = vrot.slane %v1694_v2, 6 }
0x2360   :  { %v1697_v6 = vpop.permute.xlu1 %1696 }
0x2361   :  { %2634 = vmatmul.mubr.msk.f32.vlgmr.msra.gmra.mrb[16].mxu0 %vm68_vm1, %v1697_v6 }
0x2434   :  { %v1766_v10 = vpop.f32.mrb[16].mxu0 }
0x2435   :  { %v1767_v11 = vadd.f32 %v1766_v10, %v3291_v12  ;;  %v2635_v13 = vpop.f32.mrb[17].mxu0  ;;  %v45_v10 = vld [vmem:[%s3457_s2 + $0x30] sm:$0xff] }
0x2437   :  { %v1771_v15 = vrot.slane %v1767_v11, 6  ;;  %v46_v11 = vld [vmem:[%s3457_s2 + $0x38] sm:$0xff] }
0x2438   :  { %v2810_v13 = vpack.c.bf16 %v46_v11, %v45_v10 }
0x2439   :  { %1780 = vrot.lane.b32.xlu0 %v1771_v15, %s2976_s11  ;;  %v1773_v18 = vadd.f32 %v1771_v15, %v3287_v7 }
0x243b   :  { %v2324_v22 = vmul.f32 -1.442695, %v1773_v18 }
0x243d   :  { %2914 = vpow2.f32 %v2324_v22 }
0x2447   :  { %v2915_v23 = vpop.eup %2914 }
0x2448   :  { %v1777_v21 = vadd.f32 1.0, %v2915_v23 }
0x244a   :  { %2916 = vrcp.f32 %v1777_v21 }
0x2454   :  { %v2917_v24 = vpop.eup %2916 }
0x2455   :  { %v1790_v59 = vsub.f32 1.0, %v2917_v24  ;;  %v1798_v33 = vmul.f32 %v2917_v24, %v1796_v1  ;;  %v2149_v1 = vsub.s32 5, %v3065_v17 }
0x24ab   :  { %v1781_v25 = vpop.permute.xlu0 %1780 }
0x24ac   :  { %v1783_v27 = vmul.f32 %v2917_v24, %v1781_v25  ;;  %v47_v25 = vld [vmem:[%s3457_s2 + $0x40] sm:$0xff] }
0x24ae   :  { %1785 = vrot.lane.b32.xlu1 %v1783_v27, %s2976_s11  ;;  %v48_v27 = vld [vmem:[%s3457_s2 + $0x48] sm:$0xff] }
0x24b2   :  { %2832 = vrot.lane.b32.xlu1 %v2831_v4, %s2977_s12 }
0x2520   :  { %v1786_v12 = vpop.permute.xlu1 %1785 }
0x2521   :  { %v1788_v28 = vadd.f32 %v1786_v12, %v3287_v7  ;;  %v49_v12 = vld [vmem:[%s3457_s2 + $0x50] sm:$0xff] }
0x2523   :  { %2918 = vtanh.f32 %v1788_v28  ;;  %v2814_v28 = vpack.c.bf16 %v48_v27, %v47_v25 }
0x2524   :  { %v2833_v19 = vpop.permute.xlu1 %2832 }
0x2525   :  { %v2835_v30 = vunpack.i.h.bf16 %v2833_v19  ;;  %v2834_v31 = vunpack.i.l.bf16 %v2833_v19  ;;  %v50_v19 = vld [vmem:[%s3457_s2 + $0x58] sm:$0xff] }
0x2527   :  { %v2788_v9 = vpack.c.bf16 %v2835_v30, %v2834_v31  ;;  %v2818_v30 = vpack.c.bf16 %v50_v19, %v49_v12 }
0x2529   :  { %2790 = vmatprep.subr.msk.bf16.mxu1 %vm2789_vm5, %v2788_v9  ;;  %2795 = vmatprep.subr.bf16.mxu0 %v2788_v9 }
0x252a   :  { %2793 = vmatpush3.bf16.xpose.msk.msra.mxu1 %vm2789_vm5, %v2788_v9  ;;  %2797 = vmatpush3.bf16.msra.mxu0 %v2788_v9 }
0x252b   :  { %2799 = vmatprep.subr.bf16.mxu1 %v2798_v62  ;;  %2815 = vmatprep.subr.bf16.mxu0 %v2814_v28 }
0x252d   :  { %v2919_v32 = vpop.eup %2918 }
0x252e   :  { %1792 = vrot.lane.b32.xlu0 %v2919_v32, %s2977_s12 }
0x2532   :  { %1806 = vrot.lane.b32.xlu0 %v1802_v48, %s2977_s12 }
0x25a0   :  { %v1793_v4 = vpop.permute.xlu0 %1792 }
0x25a1   :  { %v1795_v7 = vmul.f32 %v1793_v4, %v1790_v59  ;;  %v2948_v4 = vld [vmem:[%s3458_s3] sm:$0xff] }
0x25a3   :  { %v1799_v34 = vadd.f32 %v1798_v33, %v1795_v7  ;;  %v2150_v7 = vrot.slane %v2948_v4, %v2149_v1 }
0x25a4   :  { %v3372_v14 = vpop.permute.xlu0 %1806 }
0x25a5   :  { %2640 = vmatprep.mubr.msk.f32.mxu1 %vm68_vm1, %v3372_v14  ;;  %v1803_v35 = vsel %vm986_vm2, %v1694_v2, %v1799_v34  ;;  %v44_v2 = vld [vmem:[%s3457_s2 + $0x28] sm:$0xff]  ;;  %s2979_s2 = smov [#allocation2]  }
0x25a6   :  { %1808 = vrot.lane.b32.xlu1 %v1803_v35, %s2977_s12  ;;  %v2806_v6 = vpack.c.bf16 %v44_v2, %v43_v0  ;;  %s2281_s3 = sshll.u32 %s2979_s2, 4  ;;  %s2282_s3 = int_to_ptr.vmem [resolvable:$true] %s2281_s3 }
0x25a7   :  { %s2949_s17 = scalar_lea.vmem %s2282_s3, 256  ;;  %p2954_p1 = scmp.lt.s32.totalorder %s2282_s3, %s2282_s3 }
0x25a8   :  { %p2950_p0 = scmp.ne.s32.totalorder %s2282_s3, %s2949_s17  ;;  %p2955_p2 = scmp.lt.s32.totalorder %s2949_s17, %s2949_s17 }
0x25aa   :  { %p2956_p3 = por %p2955_p2, %p2954_p1 }
0x25ac   :  { %p2957_p4 = pnand %p2956_p3, %p2950_p0 }
0x2618   :  { %v3378_v36 = vpop.permute.xlu1 %1808 }
0x2619   :  { %2641 = vmatmul.mubr.msk.f32.vlgmr.msra.gmra.mrb[16].mxu1 %vm68_vm1, %v3378_v36 }
0x261a   :  { %2801 = vmatpush3.bf16.msra.mxu1 %v2798_v62 }
0x261b   :  { %2803 = vmatprep.subr.bf16.mxu1 %v2802_v5 }
0x261e   :  { %2805 = vmatpush3.bf16.msra.mxu1 %v2802_v5 }
0x261f   :  { %2807 = vmatprep.subr.bf16.mxu1 %v2806_v6 }
0x2622   :  { %2809 = vmatpush3.bf16.msra.mxu1 %v2806_v6 }
0x2623   :  { %2811 = vmatprep.subr.bf16.mxu1 %v2810_v13 }
0x2626   :  { %2813 = vmatpush3.bf16.msra.mxu1 %v2810_v13 }
0x26ec   :  { %v2642_v46 = vpop.f32.mrb[16].mxu1 }
0x26ed   :  { %v1943_v39 = vsel %vm1941_vm6, %v2642_v46, -1e+30  ;;  %v1890_v40 = vpop.f32.mrb[17].mxu1 }
0x26ee   :  { %v1942_v26 = vsel %vm1940_vm7, %v1890_v40, -1e+30  ;;  %v1949_v42 = vsel %vm1948_vm8, %v1943_v39, -inf }
0x26ef   :  { %1950 = vmax.xlane.f32.xlu1 %v1949_v42  ;;  %v1945_v43 = vsel %vm1944_vm9, %v1942_v26, -inf }
0x26f0   :  { %1946 = vmax.xlane.f32.xlu0 %v1945_v43 }
0x277c   :  { %v1951_v44 = vpop.xlane.xlu1 %1950 }
0x277d   :  { %v1953_v16 = vsub.f32 %v1943_v39, %v1951_v44  ;;  %v1947_v45 = vpop.xlane.xlu0 %1946 }
0x277e   :  { %v1952_v47 = vsub.f32 %v1942_v26, %v1947_v45 }
0x277f   :  { %v1956_v48 = vmul.f32 1.442695, %v1953_v16 }
0x2780   :  { %v1954_v49 = vmul.f32 1.442695, %v1952_v47 }
0x2782   :  { %2920 = vpow2.f32 %v1954_v49 }
0x2783   :  { %2922 = vpow2.f32 %v1956_v48 }
0x278c   :  { %v2921_v50 = vpop.eup %2920 }
0x278d   :  { %v1958_v20 = vsel %vm1944_vm9, %v2921_v50, 0.0  ;;  %v2923_v51 = vpop.eup %2922 }
0x278e   :  { %1959 = vadd.xlane.f32.xlu0 %v1958_v20  ;;  %v1961_v52 = vsel %vm1948_vm8, %v2923_v51, 0.0 }
0x2792   :  { %1962 = vadd.xlane.f32.xlu0 %v1961_v52 }
0x281b   :  { %v1960_v53 = vpop.xlane.xlu0 %1959 }
0x281c   :  { %2924 = vrcp.f32 %v1960_v53 }
0x281f   :  { %v1963_v54 = vpop.xlane.xlu0 %1962 }
0x2820   :  { %2926 = vrcp.f32 %v1963_v54 }
0x2826   :  { %v2925_v55 = vpop.eup %2924 }
0x2827   :  { %v1966_v56 = vmul.f32 %v2925_v55, %v2921_v50 }
0x2829   :  { %2647 = vmatprep.mubr.msk.f32.mxu0 %vm1944_vm9, %v1966_v56 }
0x282a   :  { %v2927_v57 = vpop.eup %2926 }
0x282b   :  { %v1967_v58 = vmul.f32 %v2927_v57, %v2923_v51 }
0x282d   :  { %2648 = vmatmul.mubr.msk.f32.vlgmr.msra.gmra.mrb[18].mxu0 %vm1944_vm9, %v1967_v58 }
0x282e   :  { %2817 = vmatpush3.bf16.msra.mxu0 %v2814_v28 }
0x282f   :  { %2819 = vmatprep.subr.bf16.mxu0 %v2818_v30 }
0x2832   :  { %2821 = vmatpush3.bf16.msra.mxu0 %v2818_v30 }
0x2900   :  { %v2649_v15 = vpop.f32.mrb[18].mxu0 }
0x2901   :  { %2057 = vrot.lane.b32.xlu0 %v2649_v15, %s2978_s5  ;;  %v2042_v18 = vpop.f32.mrb[19].mxu0 }
0x2902   :  { %2055 = vrot.lane.b32.xlu1 %v2042_v18, %s2978_s5 }
0x2973   :  { %v2058_v22 = vpop.permute.xlu0 %2057 }
0x2974   :  { %v2056_v23 = vpop.permute.xlu1 %2055  ;;  %v2062_v24 = vsel %vm68_vm1, %v3378_v36, %v2058_v22 }
0x2975   :  { %v2061_v21 = vsel %vm68_vm1, %v3372_v14, %v2056_v23 }
0x2976   :  { %2666 = vmatprep.mubr.msk.f32.mxu1 %vm2063_vm10, %v2061_v21 }
0x2977   :  { %2667 = vmatmul.mubr.msk.f32.vlgmr.msra.gmra.mrb[18].mxu1 %vm2063_vm10, %v2062_v24 }
0x2a4a   :  { %v2668_v31 = vpop.f32.mrb[18].mxu1 }
0x2a4b   :  { %v2136_v9 = vpop.f32.mrb[19].mxu1 }
0x2a4c   :  { %2928 = vtanh.f32 %v2136_v9 }
0x2a4d   :  { %2930 = vtanh.f32 %v2668_v31 }
0x2a56   :  { %v2929_v32 = vpop.eup %2928 }
0x2a57   :  { %v2931_v59 = vpop.eup %2930  ;;  %2677 = vmatprep.mubr.msk.f32.mxu0 %vm68_vm1, %v2929_v32 }
0x2a58   :  { %2678 = vmatmul.mubr.msk.f32.vlgmr.msra.gmra.mrb[20].mxu0 %vm68_vm1, %v2931_v59 }
0x2b2b   :  { %v2679_v33 = vpop.f32.mrb[20].mxu0 }
0x2b2c   :  { %v2229_v34 = vadd.f32 %v2679_v33, %v2150_v7  ;;  %v2223_v14 = vpop.f32.mrb[21].mxu0 }
0x2b2d   :  { %v2224_v35 = vadd.f32 %v2223_v14, %v2150_v7 }
0x2b2e   :  { %v2235_v36 = vsel %vm1948_vm8, %v2229_v34, -inf  ;;  %v2336_v43 = vmul.f32 -1.442695, %v2229_v34 }
0x2b2f   :  { %2236 = vmax.xlane.f32.xlu0 %v2235_v36  ;;  %v2232_v41 = vsel %vm1944_vm9, %v2224_v35, -inf  ;;  %v2335_v44 = vmul.f32 -1.442695, %v2224_v35 }
0x2b30   :  { %2233 = vmax.xlane.f32.xlu1 %v2232_v41 }
0x2bbc   :  { %v2237_v37 = vpop.xlane.xlu0 %2236 }
0x2bbd   :  { %v2239_v8 = vsub.f32 %v2229_v34, %v2237_v37  ;;  %v2234_v38 = vpop.xlane.xlu1 %2233 }
0x2bbe   :  { %v2238_v3 = vsub.f32 %v2224_v35, %v2234_v38 }
0x2bbf   :  { %v2242_v17 = vmul.f32 1.442695, %v2239_v8 }
0x2bc0   :  { %v2240_v46 = vmul.f32 1.442695, %v2238_v3 }
0x2bc1   :  { %2932 = vpow2.f32 %v2242_v17 }
0x2bc2   :  { %2934 = vpow2.f32 %v2240_v46 }
0x2bc3   :  { %2936 = vpow2.f32 %v2336_v43 }
0x2bc4   :  { %2938 = vpow2.f32 %v2335_v44 }
0x2bcb   :  { %v2933_v39 = vpop.eup %2932 }
0x2bcc   :  { %v2935_v40 = vpop.eup %2934  ;;  %v2247_v26 = vsel %vm1948_vm8, %v2933_v39, 0.0 }
0x2bcd   :  { %2248 = vadd.xlane.f32.xlu0 %v2247_v26  ;;  %v2244_v42 = vsel %vm1944_vm9, %v2935_v40, 0.0  ;;  %v2937_v16 = vpop.eup %2936 }
0x2bce   :  { %2245 = vadd.xlane.f32.xlu1 %v2244_v42  ;;  %v2939_v47 = vpop.eup %2938  ;;  %v2265_v49 = vadd.f32 1.0, %v2937_v16 }
0x2bcf   :  { %v2264_v50 = vadd.f32 1.0, %v2939_v47 }
0x2c5a   :  { %v2249_v45 = vpop.xlane.xlu0 %2248 }
0x2c5b   :  { %2940 = vlog2.f32 %v2249_v45  ;;  %v2246_v48 = vpop.xlane.xlu1 %2245 }
0x2c5c   :  { %2942 = vlog2.f32 %v2246_v48 }
0x2c5d   :  { %2944 = vrcp.f32 %v2265_v49 }
0x2c5e   :  { %2946 = vrcp.f32 %v2264_v50 }
0x2c65   :  { %v2941_v20 = vpop.eup %2940 }
0x2c66   :  { %v2943_v51 = vpop.eup %2942  ;;  %v2253_v52 = vmul.f32 0.6931472, %v2941_v20 }
0x2c67   :  { %v2251_v53 = vmul.f32 0.6931472, %v2943_v51  ;;  %v2945_v57 = vpop.eup %2944 }
0x2c68   :  { %v2255_v54 = vadd.f32 %v2253_v52, %v2237_v37  ;;  %v2947_v60 = vpop.eup %2946 }
0x2c69   :  { %v2254_v55 = vadd.f32 %v2251_v53, %v2234_v38 }
0x2c6a   :  { %v2257_v56 = vsub.f32 %v2229_v34, %v2255_v54 }
0x2c6b   :  { %v2256_v58 = vsub.f32 %v2224_v35, %v2254_v55 }
0x2c6c   :  { %v2271_v29 = vsel %vm1944_vm9, %v2257_v56, %v2945_v57 }
0x2c6d   :  { %v2270_v61 = vsel %vm1944_vm9, %v2256_v58, %v2947_v60  ;;  %2275 = vst.msk [vmem:[#allocation2 + $0x8] sm:$0xf] %vm2274_vm11, %v2271_v29 }
0x2c6e   :  { %2273 = vst.msk [vmem:[#allocation2] sm:$0xff] %vm2272_vm12, %v2270_v61 }
0x2c6f   :  { %2960 = shalt.err (!%p2957_p4)
}
0x2c70   :  { %s2961_s12 = scalar_lea.hbm %s3459_s4, 256 }
0x2c71   :  { %p2962_p5 = scmp.ne.s32.totalorder %s3459_s4, %s2961_s12  ;;  %p2965_p6 = scmp.lt.u32.totalorder %s2961_s12, %s3459_s4 }
0x2c73   :  { %p2967_p7 = pnand %p2965_p6, %p2962_p5 }
0x2c75   :  { %2970 = shalt.err (!%p2967_p7)
}
0x2c76   :  { %s2980_s22 = smov 128   ;;  %s2981_s23 = smov 8  }
0x2c77   :  { %2287 = dma.vmem_to_hbm [thread:$0]  %s2282_s3, 256, %s3459_s4, [#allocation3], %s2980_s22, %s2980_s22, %s2981_s23  }
0x2c78   :  { %2971 = dma.done.wait [#allocation3], 256  }
0x2c79   :  { %2972 = vsyncadd [#allocation3], 4294967040 }
0x2c7a   :  { %2291 = vsyncpa [#allocation3], 1 }

</bundles_post_ra>
